<compile_context>
chip_gen: v7x
topology: tpu7x:2x2x1
jax: 0.10.0
libtpu: 0.0.40
codegen_flags: <defaults>
</compile_context>

<pallas_src>
import functools

import jax
import jax.numpy as jnp
from jax import lax
from jax.experimental import pallas as pl
from jax.experimental.pallas import tpu as pltpu


def _bottleneck_kernel(stride, has_sc, x_ref, w1_ref, w2_ref, w3_ref,
                       b1_ref, b2_ref, b3_ref, *rest):
    """One (batch, row-tile) grid step.

    x_ref  : (1, H+2, W, Cin) bf16  whole H-zero-padded image (resident per batch item)
    w1_ref : (Cin, P)         bf16  conv1 1x1, BN1 scale folded
    w2_ref : (3, 3P, P)       bf16  conv2 3x3, per-ky (kx,cin)->cout matrices, BN2 folded
    w3_ref : (P, Cout)        bf16  conv3 1x1, BN3 folded
    b*_ref : (1, C)           f32   folded BN biases
    rest   : [wsc_ref (Cin,Cout) bf16, bsc_ref (1,Cout) f32,]  o_ref (1, TH, Wo, Cout)
    """
    if has_sc:
        wsc_ref, bsc_ref, o_ref = rest
    else:
        (o_ref,) = rest

    H = x_ref.shape[1] - 2
    W = x_ref.shape[2]
    Cin = x_ref.shape[3]
    P = w1_ref.shape[1]
    TH = o_ref.shape[1]
    Wo = o_ref.shape[2]
    Cout = o_ref.shape[3]
    TH_in = stride * TH + 2                       # rows needed incl. 1-row halo each side

    r = pl.program_id(1)
    row0 = r * (TH * stride)                      # first padded-x row of this tile

    # ---- conv1 (1x1) + bn1 + relu on TH_in rows (includes the halo rows) ----
    xt = x_ref[0, pl.ds(row0, TH_in), :, :]                       # (TH_in, W, Cin) bf16
    h1 = jnp.dot(xt.reshape(TH_in * W, Cin), w1_ref[...],
                 preferred_element_type=jnp.float32)
    h1 = jnp.maximum(h1 + b1_ref[...], 0.0)
    # Rows that come from conv2's zero padding (padded-x rows 0 and H+1) must be exactly
    # zero; the bias/relu above would otherwise leave relu(b1) in them.
    f = lax.broadcasted_iota(jnp.int32, (TH_in * W, P), 0)
    valid = (f >= (1 - row0) * W) & (f < (H + 1 - row0) * W)
    h1 = jnp.where(valid, h1, 0.0).reshape(TH_in, W, P)           # f32

    # Column-edge masks for the two shifted taps (built in-kernel: no captured consts).
    # kx = 0 reads column j-1 -> invalid at j == 0; kx = 2 reads j+1 -> invalid at j == W-1.
    col = lax.broadcasted_iota(jnp.int32, (TH * W, 1), 0) % W
    edge_ok = {0: col != 0, 2: col != (W - 1)}

    # ---- conv2 (3x3, stride, pad=1) + bn2 + relu: 3 matmuls with K = 3P ----
    acc = jnp.zeros((TH * Wo, P), jnp.float32)
    for dy in range(3):
        win = h1[dy:dy + stride * TH]                             # (stride*TH, W, P)
        if stride > 1:
            win = win.reshape(TH, stride, W, P)[:, 0]             # keep every stride-th row
        rows = win.reshape(TH * W, P)
        taps = []
        for dx in range(3):
            d = dx - 1
            if d == 0:
                taps.append(rows)
            else:
                t = pltpu.roll(rows, shift=(-d) % (TH * W), axis=0)
                taps.append(jnp.where(edge_ok[dx], t, 0.0))
        patch = jnp.concatenate(taps, axis=-1)                    # (TH*W, 3P)
        if stride > 1:
            patch = patch.reshape(TH, Wo, stride, 3 * P)[:, :, 0, :]
            patch = patch.reshape(TH * Wo, 3 * P)
        acc = acc + jnp.dot(patch.astype(jnp.bfloat16), w2_ref[dy],
                            preferred_element_type=jnp.float32)
    h2 = jnp.maximum(acc + b2_ref[...], 0.0).astype(jnp.bfloat16)  # (TH*Wo, P)

    # ---- conv3 (1x1) + bn3 ----
    h3 = jnp.dot(h2, w3_ref[...], preferred_element_type=jnp.float32) + b3_ref[...]

    # ---- shortcut ----
    xs = xt[1:1 + stride * TH]                                    # real rows of this tile
    if stride > 1:
        xs = xs.reshape(TH, stride, W, Cin)[:, 0]                 # row decimation
        xs = xs.reshape(TH, Wo, stride, Cin)[:, :, 0, :]          # column decimation
    if has_sc:
        sc = jnp.dot(xs.reshape(TH * Wo, Cin), wsc_ref[...],
                     preferred_element_type=jnp.float32) + bsc_ref[...]
    else:
        sc = xs.reshape(TH * Wo, Cin).astype(jnp.float32)         # identity (Cin == Cout)

    out = jnp.maximum(h3 + sc, 0.0)
    o_ref[0] = out.reshape(TH, Wo, Cout).astype(o_ref.dtype)


def _fold_bn(gamma, beta, mean, var, eps=1e-5):
    scale = gamma / jnp.sqrt(var + eps)
    bias = beta - mean * scale
    return scale, bias


def _pick_row_tile(ho, target=8):
    if ho <= target:
        return ho
    for t in range(target, 0, -1):
        if ho % t == 0:
            return t
    return 1


def bottleneck_pallas(x_nchw, p, stride=1):
    N, Cin, H, W = x_nchw.shape
    P = p['w1'].shape[0]
    Cout = p['w3'].shape[0]
    has_sc = (stride != 1) or (Cin != Cout)
    if stride != 1:
        # TODO(synk): H/W not divisible by stride needs asymmetric halo handling.
        assert H % stride == 0 and W % stride == 0
    Ho, Wo = H // stride, W // stride
    TH = _pick_row_tile(Ho)
    R = Ho // TH

    s1, b1 = _fold_bn(*p['bn1'])
    s2, b2 = _fold_bn(*p['bn2'])
    s3, b3 = _fold_bn(*p['bn3'])

    # NCHW -> NHWC, conv2's H zero-padding done once here, activations in bf16.
    x = jnp.transpose(x_nchw, (0, 2, 3, 1))
    x = jnp.pad(x, ((0, 0), (1, 1), (0, 0), (0, 0))).astype(jnp.bfloat16)

    # BN scale folded into the conv weights (bf16 MXU operands); biases stay f32.
    w1 = (jnp.transpose(p['w1'][:, :, 0, 0], (1, 0)) * s1).astype(jnp.bfloat16)   # (Cin, P)
    w2 = jnp.transpose(p['w2'] * s2[:, None, None, None], (2, 3, 1, 0))           # (3,3,P,P)
    w2 = w2.reshape(3, 3 * P, P).astype(jnp.bfloat16)                             # per-ky (3P, P)
    w3 = (jnp.transpose(p['w3'][:, :, 0, 0], (1, 0)) * s3).astype(jnp.bfloat16)   # (P, Cout)
    b1 = b1.reshape(1, P)
    b2 = b2.reshape(1, P)
    b3 = b3.reshape(1, Cout)

    args = [x, w1, w2, w3, b1, b2, b3]
    in_specs = [
        pl.BlockSpec((1, H + 2, W, Cin), lambda n, r: (n, 0, 0, 0)),  # resident per n
        pl.BlockSpec((Cin, P), lambda n, r: (0, 0)),
        pl.BlockSpec((3, 3 * P, P), lambda n, r: (0, 0, 0)),
        pl.BlockSpec((P, Cout), lambda n, r: (0, 0)),
        pl.BlockSpec((1, P), lambda n, r: (0, 0)),
        pl.BlockSpec((1, P), lambda n, r: (0, 0)),
        pl.BlockSpec((1, Cout), lambda n, r: (0, 0)),
    ]
    if has_sc:
        ssc, bsc = _fold_bn(*p['bnsc'])
        wsc = (jnp.transpose(p['wsc'][:, :, 0, 0], (1, 0)) * ssc).astype(jnp.bfloat16)
        args += [wsc, bsc.reshape(1, Cout)]
        in_specs += [pl.BlockSpec((Cin, Cout), lambda n, r: (0, 0)),
                     pl.BlockSpec((1, Cout), lambda n, r: (0, 0))]

    flops = 2 * N * (H * W * Cin * P + Ho * Wo * 9 * P * P + Ho * Wo * P * Cout
                     + (Ho * Wo * Cin * Cout if has_sc else 0))
    bytes_accessed = (sum(int(a.size) * a.dtype.itemsize for a in args)
                      + N * Ho * Wo * Cout * x_nchw.dtype.itemsize)

    kernel = functools.partial(_bottleneck_kernel, stride, has_sc)
    out = pl.pallas_call(
        kernel,
        out_shape=jax.ShapeDtypeStruct((N, Ho, Wo, Cout), x_nchw.dtype),
        grid_spec=pltpu.PrefetchScalarGridSpec(
            num_scalar_prefetch=0,
            grid=(N, R),
            in_specs=in_specs,
            out_specs=pl.BlockSpec((1, TH, Wo, Cout), lambda n, r: (n, r, 0, 0)),
        ),
        compiler_params=pltpu.CompilerParams(
            dimension_semantics=("parallel", "parallel"),
            vmem_limit_bytes=32 * 1024 * 1024),
        cost_estimate=pl.CostEstimate(flops=flops, transcendentals=0,
                                      bytes_accessed=bytes_accessed),
    )(*args)
    return jnp.transpose(out, (0, 3, 1, 2))       # back to NCHW at the module boundary


# ---------------------------- references for testing ----------------------------
def _conv(x, w, s, pad):
    return lax.conv_general_dilated(
        x, w, (s, s), pad, dimension_numbers=('NCHW', 'OIHW', 'NCHW'),
        precision=lax.Precision.HIGHEST)


def bottleneck_ref(x_nchw, p, stride=1, eps=1e-5):
    """Pure-f32 torch-semantics reference (inference-mode BN)."""
    def bn(x, bnp):
        g, b, m, v = (a.reshape(1, -1, 1, 1) for a in bnp)
        return (x - m) / jnp.sqrt(v + eps) * g + b

    out = jax.nn.relu(bn(_conv(x_nchw, p['w1'], 1, 'VALID'), p['bn1']))
    out = jax.nn.relu(bn(_conv(out, p['w2'], stride, [(1, 1), (1, 1)]), p['bn2']))
    out = bn(_conv(out, p['w3'], 1, 'VALID'), p['bn3'])
    if 'wsc' in p:
        sc = bn(_conv(x_nchw, p['wsc'], stride, 'VALID'), p['bnsc'])
    else:
        sc = x_nchw
    return jax.nn.relu(out + sc)


def bottleneck_ref_bf16(x_nchw, p, stride=1, eps=1e-5):
    """Reference that mirrors the kernel's bf16-operand / f32-accumulate arithmetic."""
    rd = lambda a: a.astype(jnp.bfloat16).astype(jnp.float32)

    def fold(w, bn):
        g, b, m, v = bn
        s = g / jnp.sqrt(v + eps)
        return rd(w * s.reshape(-1, 1, 1, 1)), (b - m * s).reshape(1, -1, 1, 1)

    w1, b1 = fold(p['w1'], p['bn1'])
    w2, b2 = fold(p['w2'], p['bn2'])
    w3, b3 = fold(p['w3'], p['bn3'])
    xq = rd(x_nchw)
    h = rd(jax.nn.relu(_conv(xq, w1, 1, 'VALID') + b1))
    h = rd(jax.nn.relu(_conv(h, w2, stride, [(1, 1), (1, 1)]) + b2))
    h = _conv(h, w3, 1, 'VALID') + b3
    if 'wsc' in p:
        wsc, bsc = fold(p['wsc'], p['bnsc'])
        sc = _conv(xq, wsc, stride, 'VALID') + bsc
    else:
        sc = xq
    return jax.nn.relu(h + sc)


def init_params(key, in_planes, planes, stride):
    expansion = 4
    out_planes = expansion * planes
    ks = jax.random.split(key, 8)

    def conv_w(k, o, i, kh, kw):
        return jax.random.normal(k, (o, i, kh, kw), jnp.float32) / ((i * kh * kw) ** 0.5)

    def bn_p(k, c):
        k1, k2, k3, k4 = jax.random.split(k, 4)
        return (1.0 + 0.1 * jax.random.normal(k1, (c,), jnp.float32),   # gamma
                0.1 * jax.random.normal(k2, (c,), jnp.float32),         # beta
                0.1 * jax.random.normal(k3, (c,), jnp.float32),         # running_mean
                1.0 + 0.1 * jax.random.uniform(k4, (c,), jnp.float32))  # running_var

    p = {
        'w1': conv_w(ks[0], planes, in_planes, 1, 1), 'bn1': bn_p(ks[1], planes),
        'w2': conv_w(ks[2], planes, planes, 3, 3),    'bn2': bn_p(ks[3], planes),
        'w3': conv_w(ks[4], out_planes, planes, 1, 1), 'bn3': bn_p(ks[5], out_planes),
    }
    if stride != 1 or in_planes != out_planes:
        p['wsc'] = conv_w(ks[6], out_planes, in_planes, 1, 1)
        p['bnsc'] = bn_p(ks[7], out_planes)
    return p


if __name__ == "__main__":
    key = jax.random.PRNGKey(0)
    kx1, kp1, kx2, kp2 = jax.random.split(key, 4)
    H = W = 16

    # Case 1: projection shortcut (in_planes != 4*planes), stride 1.
    N, in_planes, planes, stride = 2, 16, 8, 1
    x = jax.random.normal(kx1, (N, in_planes, H, W), jnp.float32)
    params = init_params(kp1, in_planes, planes, stride)
    out = jax.block_until_ready(bottleneck_pallas(x, params, stride))
    ref_strict = bottleneck_ref_bf16(x, params, stride)
    ref_f32 = bottleneck_ref(x, params, stride)
    assert out.shape == ref_f32.shape, (out.shape, ref_f32.shape)
    assert jnp.allclose(out, ref_strict, atol=3e-3, rtol=3e-3), \
        float(jnp.max(jnp.abs(out - ref_strict)))
    assert jnp.allclose(out, ref_f32, atol=1e-1, rtol=1e-1), \
        float(jnp.max(jnp.abs(out - ref_f32)))

    # Case 2: identity shortcut (in_planes == 4*planes), stride 1.
    N2, in2, planes2, stride2 = 2, 32, 8, 1
    x2 = jax.random.normal(kx2, (N2, in2, H, W), jnp.float32)
    params2 = init_params(kp2, in2, planes2, stride2)
    out2 = jax.block_until_ready(bottleneck_pallas(x2, params2, stride2))
    ref2_strict = bottleneck_ref_bf16(x2, params2, stride2)
    assert jnp.allclose(out2, ref2_strict, atol=3e-3, rtol=3e-3), \
        float(jnp.max(jnp.abs(out2 - ref2_strict)))

    print("KERNEL_OK")
</pallas_src>

<mosaic_0001>
module attributes {stable_mosaic.version = 11 : i64} {
  func.func @_bottleneck_kernel(%arg0: i32, %arg1: i32, %arg2: memref<1x18x16x16xbf16, #tpu.memory_space<vmem>>, %arg3: memref<16x8xbf16, #tpu.memory_space<vmem>>, %arg4: memref<3x24x8xbf16, #tpu.memory_space<vmem>>, %arg5: memref<8x32xbf16, #tpu.memory_space<vmem>>, %arg6: memref<1x8xf32, #tpu.memory_space<vmem>>, %arg7: memref<1x8xf32, #tpu.memory_space<vmem>>, %arg8: memref<1x32xf32, #tpu.memory_space<vmem>>, %arg9: memref<16x32xbf16, #tpu.memory_space<vmem>>, %arg10: memref<1x32xf32, #tpu.memory_space<vmem>>, %arg11: memref<1x8x16x32xf32, #tpu.memory_space<vmem>>) attributes {dimension_semantics = [#tpu.dimension_semantics<parallel>, #tpu.dimension_semantics<parallel>], iteration_bounds = array<i64: 2, 2>, scalar_prefetch = 0 : i64, scratch_operands = 0 : i64, tpu.core_type = #tpu.core_type<tc>, window_params = [{transform_indices = @transform_0, window_bounds = array<i64: 1, 18, 16, 16>}, {pipeline_mode = #tpu.pipeline_mode<synchronous>, transform_indices = @transform_1, window_bounds = array<i64: 16, 8>}, {pipeline_mode = #tpu.pipeline_mode<synchronous>, transform_indices = @transform_2, window_bounds = array<i64: 3, 24, 8>}, {pipeline_mode = #tpu.pipeline_mode<synchronous>, transform_indices = @transform_3, window_bounds = array<i64: 8, 32>}, {pipeline_mode = #tpu.pipeline_mode<synchronous>, transform_indices = @transform_4, window_bounds = array<i64: 1, 8>}, {pipeline_mode = #tpu.pipeline_mode<synchronous>, transform_indices = @transform_5, window_bounds = array<i64: 1, 8>}, {pipeline_mode = #tpu.pipeline_mode<synchronous>, transform_indices = @transform_6, window_bounds = array<i64: 1, 32>}, {pipeline_mode = #tpu.pipeline_mode<synchronous>, transform_indices = @transform_7, window_bounds = array<i64: 16, 32>}, {pipeline_mode = #tpu.pipeline_mode<synchronous>, transform_indices = @transform_8, window_bounds = array<i64: 1, 32>}, {transform_indices = @transform_9, window_bounds = array<i64: 1, 8, 16, 32>}]} {
    %c8_i32 = arith.constant 8 : i32
    %0 = arith.muli %arg1, %c8_i32 : i32
    %c0 = arith.constant 0 : index
    %1 = arith.index_cast %0 : i32 to index
    %c0_0 = arith.constant 0 : index
    %c0_1 = arith.constant 0 : index
    %2 = vector.load %arg2[%c0, %1, %c0_0, %c0_1] : memref<1x18x16x16xbf16, #tpu.memory_space<vmem>>, vector<1x10x16x16xbf16>
    %3 = vector.shape_cast %2 : vector<1x10x16x16xbf16> to vector<10x16x16xbf16>
    %4 = vector.shape_cast %3 : vector<10x16x16xbf16> to vector<160x16xbf16>
    %c0_2 = arith.constant 0 : index
    %c0_3 = arith.constant 0 : index
    %5 = vector.load %arg3[%c0_2, %c0_3] : memref<16x8xbf16, #tpu.memory_space<vmem>>, vector<16x8xbf16>
    %cst = arith.constant dense<0.000000e+00> : vector<160x8xf32>
    %6 = tpu.matmul %4, %5, %cst {dimension_numbers = #tpu.dot_dimension_numbers<[1], [0], [0], [1], [0, 0, 1, 1], [], []>} : vector<160x16xbf16>, vector<16x8xbf16>, vector<160x8xf32> -> vector<160x8xf32>
    %c0_4 = arith.constant 0 : index
    %c0_5 = arith.constant 0 : index
    %7 = vector.load %arg6[%c0_4, %c0_5] : memref<1x8xf32, #tpu.memory_space<vmem>>, vector<1x8xf32>
    %8 = vector.broadcast %7 : vector<1x8xf32> to vector<160x8xf32>
    %9 = arith.addf %6, %8 : vector<160x8xf32>
    %cst_6 = arith.constant 0.000000e+00 : f32
    %10 = vector.broadcast %cst_6 : f32 to vector<160x8xf32>
    %11 = arith.maximumf %9, %10 : vector<160x8xf32>
    %12 = tpu.iota {dimensions = array<i32: 0>} : vector<160x8xi32>
    %c1_i32 = arith.constant 1 : i32
    %13 = arith.subi %c1_i32, %0 : i32
    %c16_i32 = arith.constant 16 : i32
    %14 = arith.muli %13, %c16_i32 : i32
    %15 = vector.broadcast %14 : i32 to vector<160x8xi32>
    %16 = arith.cmpi sge, %12, %15 : vector<160x8xi32>
    %c17_i32 = arith.constant 17 : i32
    %17 = arith.subi %c17_i32, %0 : i32
    %c16_i32_7 = arith.constant 16 : i32
    %18 = arith.muli %17, %c16_i32_7 : i32
    %19 = vector.broadcast %18 : i32 to vector<160x8xi32>
    %20 = arith.cmpi slt, %12, %19 : vector<160x8xi32>
    %21 = arith.andi %16, %20 : vector<160x8xi1>
    %cst_8 = arith.constant 0.000000e+00 : f32
    %22 = vector.broadcast %cst_8 : f32 to vector<160x8xf32>
    %23 = arith.select %21, %11, %22 : vector<160x8xi1>, vector<160x8xf32>
    %24 = vector.shape_cast %23 : vector<160x8xf32> to vector<10x16x8xf32>
    %25 = tpu.iota {dimensions = array<i32: 0>} : vector<128x1xi32>
    %c16_i32_9 = arith.constant 16 : i32
    %c0_i32 = arith.constant 0 : i32
    %26 = arith.cmpi eq, %c16_i32_9, %c0_i32 : i32
    %c1_i32_10 = arith.constant 1 : i32
    %27 = arith.select %26, %c1_i32_10, %c16_i32_9 : i32
    %28 = vector.broadcast %27 : i32 to vector<128x1xi32>
    %29 = arith.remsi %25, %28 : vector<128x1xi32>
    %c0_i32_11 = arith.constant 0 : i32
    %30 = vector.broadcast %c0_i32_11 : i32 to vector<128x1xi32>
    %31 = arith.cmpi ne, %29, %30 : vector<128x1xi32>
    %c0_i32_12 = arith.constant 0 : i32
    %32 = vector.broadcast %c0_i32_12 : i32 to vector<128x1xi32>
    %33 = arith.cmpi slt, %29, %32 : vector<128x1xi32>
    %c0_i32_13 = arith.constant 0 : i32
    %34 = arith.cmpi slt, %27, %c0_i32_13 : i32
    %35 = vector.broadcast %34 : i1 to vector<128x1xi1>
    %36 = vector.broadcast %35 : vector<128x1xi1> to vector<128x1xi1>
    %37 = arith.xori %33, %36 : vector<128x1xi1>
    %38 = arith.andi %37, %31 : vector<128x1xi1>
    %39 = vector.broadcast %27 : i32 to vector<128x1xi32>
    %40 = arith.addi %29, %39 : vector<128x1xi32>
    %41 = arith.select %38, %40, %29 : vector<128x1xi1>, vector<128x1xi32>
    %c0_i32_14 = arith.constant 0 : i32
    %42 = vector.broadcast %c0_i32_14 : i32 to vector<128x1xi32>
    %43 = arith.cmpi ne, %41, %42 : vector<128x1xi32>
    %c15_i32 = arith.constant 15 : i32
    %44 = vector.broadcast %c15_i32 : i32 to vector<128x1xi32>
    %45 = arith.cmpi ne, %41, %44 : vector<128x1xi32>
    %cst_15 = arith.constant 0.000000e+00 : f32
    %46 = vector.broadcast %cst_15 : f32 to vector<128x8xf32>
    %47 = vector.extract_strided_slice %24 {offsets = [0, 0, 0], sizes = [8, 16, 8], strides = [1, 1, 1]} : vector<10x16x8xf32> to vector<8x16x8xf32>
    %48 = vector.shape_cast %47 : vector<8x16x8xf32> to vector<128x8xf32>
    %c1_i32_16 = arith.constant 1 : i32
    %49 = tpu.dynamic_rotate %48 by %c1_i32_16 dim 0 : vector<128x8xf32>, i32 -> vector<128x8xf32>
    %cst_17 = arith.constant 0.000000e+00 : f32
    %50 = vector.shape_cast %43 : vector<128x1xi1> to vector<128x1xi1>
    %51 = vector.broadcast %50 : vector<128x1xi1> to vector<128x8xi1>
    %52 = vector.broadcast %cst_17 : f32 to vector<128x8xf32>
    %53 = arith.select %51, %49, %52 : vector<128x8xi1>, vector<128x8xf32>
    %c127_i32 = arith.constant 127 : i32
    %54 = tpu.dynamic_rotate %48 by %c127_i32 dim 0 : vector<128x8xf32>, i32 -> vector<128x8xf32>
    %cst_18 = arith.constant 0.000000e+00 : f32
    %55 = vector.shape_cast %45 : vector<128x1xi1> to vector<128x1xi1>
    %56 = vector.broadcast %55 : vector<128x1xi1> to vector<128x8xi1>
    %57 = vector.broadcast %cst_18 : f32 to vector<128x8xf32>
    %58 = arith.select %56, %54, %57 : vector<128x8xi1>, vector<128x8xf32>
    %59 = tpu.concatenate %53, %48, %58 in 1 : vector<128x8xf32>, vector<128x8xf32>, vector<128x8xf32> -> vector<128x24xf32>
    %60 = arith.truncf %59 : vector<128x24xf32> to vector<128x24xbf16>
    %c0_19 = arith.constant 0 : index
    %c0_20 = arith.constant 0 : index
    %c0_21 = arith.constant 0 : index
    %61 = vector.load %arg4[%c0_19, %c0_20, %c0_21] : memref<3x24x8xbf16, #tpu.memory_space<vmem>>, vector<1x24x8xbf16>
    %62 = vector.shape_cast %61 : vector<1x24x8xbf16> to vector<24x8xbf16>
    %cst_22 = arith.constant dense<0.000000e+00> : vector<128x8xf32>
    %63 = tpu.matmul %60, %62, %cst_22 {dimension_numbers = #tpu.dot_dimension_numbers<[1], [0], [0], [1], [0, 0, 1, 1], [], []>} : vector<128x24xbf16>, vector<24x8xbf16>, vector<128x8xf32> -> vector<128x8xf32>
    %64 = arith.addf %46, %63 : vector<128x8xf32>
    %65 = vector.extract_strided_slice %24 {offsets = [1, 0, 0], sizes = [8, 16, 8], strides = [1, 1, 1]} : vector<10x16x8xf32> to vector<8x16x8xf32>
    %66 = vector.shape_cast %65 : vector<8x16x8xf32> to vector<128x8xf32>
    %c1_i32_23 = arith.constant 1 : i32
    %67 = tpu.dynamic_rotate %66 by %c1_i32_23 dim 0 : vector<128x8xf32>, i32 -> vector<128x8xf32>
    %cst_24 = arith.constant 0.000000e+00 : f32
    %68 = vector.shape_cast %43 : vector<128x1xi1> to vector<128x1xi1>
    %69 = vector.broadcast %68 : vector<128x1xi1> to vector<128x8xi1>
    %70 = vector.broadcast %cst_24 : f32 to vector<128x8xf32>
    %71 = arith.select %69, %67, %70 : vector<128x8xi1>, vector<128x8xf32>
    %c127_i32_25 = arith.constant 127 : i32
    %72 = tpu.dynamic_rotate %66 by %c127_i32_25 dim 0 : vector<128x8xf32>, i32 -> vector<128x8xf32>
    %cst_26 = arith.constant 0.000000e+00 : f32
    %73 = vector.shape_cast %45 : vector<128x1xi1> to vector<128x1xi1>
    %74 = vector.broadcast %73 : vector<128x1xi1> to vector<128x8xi1>
    %75 = vector.broadcast %cst_26 : f32 to vector<128x8xf32>
    %76 = arith.select %74, %72, %75 : vector<128x8xi1>, vector<128x8xf32>
    %77 = tpu.concatenate %71, %66, %76 in 1 : vector<128x8xf32>, vector<128x8xf32>, vector<128x8xf32> -> vector<128x24xf32>
    %78 = arith.truncf %77 : vector<128x24xf32> to vector<128x24xbf16>
    %c1 = arith.constant 1 : index
    %c0_27 = arith.constant 0 : index
    %c0_28 = arith.constant 0 : index
    %79 = vector.load %arg4[%c1, %c0_27, %c0_28] : memref<3x24x8xbf16, #tpu.memory_space<vmem>>, vector<1x24x8xbf16>
    %80 = vector.shape_cast %79 : vector<1x24x8xbf16> to vector<24x8xbf16>
    %cst_29 = arith.constant dense<0.000000e+00> : vector<128x8xf32>
    %81 = tpu.matmul %78, %80, %cst_29 {dimension_numbers = #tpu.dot_dimension_numbers<[1], [0], [0], [1], [0, 0, 1, 1], [], []>} : vector<128x24xbf16>, vector<24x8xbf16>, vector<128x8xf32> -> vector<128x8xf32>
    %82 = arith.addf %64, %81 : vector<128x8xf32>
    %83 = vector.extract_strided_slice %24 {offsets = [2, 0, 0], sizes = [8, 16, 8], strides = [1, 1, 1]} : vector<10x16x8xf32> to vector<8x16x8xf32>
    %84 = vector.shape_cast %83 : vector<8x16x8xf32> to vector<128x8xf32>
    %c1_i32_30 = arith.constant 1 : i32
    %85 = tpu.dynamic_rotate %84 by %c1_i32_30 dim 0 : vector<128x8xf32>, i32 -> vector<128x8xf32>
    %cst_31 = arith.constant 0.000000e+00 : f32
    %86 = vector.shape_cast %43 : vector<128x1xi1> to vector<128x1xi1>
    %87 = vector.broadcast %86 : vector<128x1xi1> to vector<128x8xi1>
    %88 = vector.broadcast %cst_31 : f32 to vector<128x8xf32>
    %89 = arith.select %87, %85, %88 : vector<128x8xi1>, vector<128x8xf32>
    %c127_i32_32 = arith.constant 127 : i32
    %90 = tpu.dynamic_rotate %84 by %c127_i32_32 dim 0 : vector<128x8xf32>, i32 -> vector<128x8xf32>
    %cst_33 = arith.constant 0.000000e+00 : f32
    %91 = vector.shape_cast %45 : vector<128x1xi1> to vector<128x1xi1>
    %92 = vector.broadcast %91 : vector<128x1xi1> to vector<128x8xi1>
    %93 = vector.broadcast %cst_33 : f32 to vector<128x8xf32>
    %94 = arith.select %92, %90, %93 : vector<128x8xi1>, vector<128x8xf32>
    %95 = tpu.concatenate %89, %84, %94 in 1 : vector<128x8xf32>, vector<128x8xf32>, vector<128x8xf32> -> vector<128x24xf32>
    %96 = arith.truncf %95 : vector<128x24xf32> to vector<128x24xbf16>
    %c2 = arith.constant 2 : index
    %c0_34 = arith.constant 0 : index
    %c0_35 = arith.constant 0 : index
    %97 = vector.load %arg4[%c2, %c0_34, %c0_35] : memref<3x24x8xbf16, #tpu.memory_space<vmem>>, vector<1x24x8xbf16>
    %98 = vector.shape_cast %97 : vector<1x24x8xbf16> to vector<24x8xbf16>
    %cst_36 = arith.constant dense<0.000000e+00> : vector<128x8xf32>
    %99 = tpu.matmul %96, %98, %cst_36 {dimension_numbers = #tpu.dot_dimension_numbers<[1], [0], [0], [1], [0, 0, 1, 1], [], []>} : vector<128x24xbf16>, vector<24x8xbf16>, vector<128x8xf32> -> vector<128x8xf32>
    %100 = arith.addf %82, %99 : vector<128x8xf32>
    %c0_37 = arith.constant 0 : index
    %c0_38 = arith.constant 0 : index
    %101 = vector.load %arg7[%c0_37, %c0_38] : memref<1x8xf32, #tpu.memory_space<vmem>>, vector<1x8xf32>
    %102 = vector.broadcast %101 : vector<1x8xf32> to vector<128x8xf32>
    %103 = arith.addf %100, %102 : vector<128x8xf32>
    %cst_39 = arith.constant 0.000000e+00 : f32
    %104 = vector.broadcast %cst_39 : f32 to vector<128x8xf32>
    %105 = arith.maximumf %103, %104 : vector<128x8xf32>
    %106 = arith.truncf %105 : vector<128x8xf32> to vector<128x8xbf16>
    %c0_40 = arith.constant 0 : index
    %c0_41 = arith.constant 0 : index
    %107 = vector.load %arg5[%c0_40, %c0_41] : memref<8x32xbf16, #tpu.memory_space<vmem>>, vector<8x32xbf16>
    %cst_42 = arith.constant dense<0.000000e+00> : vector<128x32xf32>
    %108 = tpu.matmul %106, %107, %cst_42 {dimension_numbers = #tpu.dot_dimension_numbers<[1], [0], [0], [1], [0, 0, 1, 1], [], []>} : vector<128x8xbf16>, vector<8x32xbf16>, vector<128x32xf32> -> vector<128x32xf32>
    %c0_43 = arith.constant 0 : index
    %c0_44 = arith.constant 0 : index
    %109 = vector.load %arg8[%c0_43, %c0_44] : memref<1x32xf32, #tpu.memory_space<vmem>>, vector<1x32xf32>
    %110 = vector.broadcast %109 : vector<1x32xf32> to vector<128x32xf32>
    %111 = arith.addf %108, %110 : vector<128x32xf32>
    %112 = vector.extract_strided_slice %3 {offsets = [1, 0, 0], sizes = [8, 16, 16], strides = [1, 1, 1]} : vector<10x16x16xbf16> to vector<8x16x16xbf16>
    %113 = vector.shape_cast %112 : vector<8x16x16xbf16> to vector<128x16xbf16>
    %c0_45 = arith.constant 0 : index
    %c0_46 = arith.constant 0 : index
    %114 = vector.load %arg9[%c0_45, %c0_46] : memref<16x32xbf16, #tpu.memory_space<vmem>>, vector<16x32xbf16>
    %cst_47 = arith.constant dense<0.000000e+00> : vector<128x32xf32>
    %115 = tpu.matmul %113, %114, %cst_47 {dimension_numbers = #tpu.dot_dimension_numbers<[1], [0], [0], [1], [0, 0, 1, 1], [], []>} : vector<128x16xbf16>, vector<16x32xbf16>, vector<128x32xf32> -> vector<128x32xf32>
    %c0_48 = arith.constant 0 : index
    %c0_49 = arith.constant 0 : index
    %116 = vector.load %arg10[%c0_48, %c0_49] : memref<1x32xf32, #tpu.memory_space<vmem>>, vector<1x32xf32>
    %117 = vector.broadcast %116 : vector<1x32xf32> to vector<128x32xf32>
    %118 = arith.addf %115, %117 : vector<128x32xf32>
    %119 = arith.addf %111, %118 : vector<128x32xf32>
    %cst_50 = arith.constant 0.000000e+00 : f32
    %120 = vector.broadcast %cst_50 : f32 to vector<128x32xf32>
    %121 = arith.maximumf %119, %120 : vector<128x32xf32>
    %122 = vector.shape_cast %121 : vector<128x32xf32> to vector<8x16x32xf32>
    %c0_51 = arith.constant 0 : index
    %c0_52 = arith.constant 0 : index
    %c0_53 = arith.constant 0 : index
    %c0_54 = arith.constant 0 : index
    %123 = vector.load %arg11[%c0_51, %c0_52, %c0_53, %c0_54] : memref<1x8x16x32xf32, #tpu.memory_space<vmem>>, vector<1x8x16x32xf32>
    %124 = vector.shape_cast %123 : vector<1x8x16x32xf32> to vector<8x16x32xf32>
    %125 = vector.shape_cast %122 : vector<8x16x32xf32> to vector<1x8x16x32xf32>
    tpu.vector_store %arg11[%c0_51, %c0_52, %c0_53, %c0_54], %125 {strides = array<i32>} : memref<1x8x16x32xf32, #tpu.memory_space<vmem>>, vector<1x8x16x32xf32>,
    return
  }
  func.func @transform_0(%arg0: i32, %arg1: i32) -> (i32, i32, i32, i32) {
    %c0_i32 = arith.constant 0 : i32
    %c0_i32_0 = arith.constant 0 : i32
    %c0_i32_1 = arith.constant 0 : i32
    %c0_i32_2 = arith.constant 0 : i32
    return %arg0, %c0_i32, %c0_i32_0, %c0_i32_1 : i32, i32, i32, i32
  }
  func.func @transform_1(%arg0: i32, %arg1: i32) -> (i32, i32) {
    %c0_i32 = arith.constant 0 : i32
    %c0_i32_0 = arith.constant 0 : i32
    %c0_i32_1 = arith.constant 0 : i32
    return %c0_i32, %c0_i32_0 : i32, i32
  }
  func.func @transform_2(%arg0: i32, %arg1: i32) -> (i32, i32, i32) {
    %c0_i32 = arith.constant 0 : i32
    %c0_i32_0 = arith.constant 0 : i32
    %c0_i32_1 = arith.constant 0 : i32
    %c0_i32_2 = arith.constant 0 : i32
    return %c0_i32, %c0_i32_0, %c0_i32_1 : i32, i32, i32
  }
  func.func @transform_3(%arg0: i32, %arg1: i32) -> (i32, i32) {
    %c0_i32 = arith.constant 0 : i32
    %c0_i32_0 = arith.constant 0 : i32
    %c0_i32_1 = arith.constant 0 : i32
    return %c0_i32, %c0_i32_0 : i32, i32
  }
  func.func @transform_4(%arg0: i32, %arg1: i32) -> (i32, i32) {
    %c0_i32 = arith.constant 0 : i32
    %c0_i32_0 = arith.constant 0 : i32
    %c0_i32_1 = arith.constant 0 : i32
    return %c0_i32, %c0_i32_0 : i32, i32
  }
  func.func @transform_5(%arg0: i32, %arg1: i32) -> (i32, i32) {
    %c0_i32 = arith.constant 0 : i32
    %c0_i32_0 = arith.constant 0 : i32
    %c0_i32_1 = arith.constant 0 : i32
    return %c0_i32, %c0_i32_0 : i32, i32
  }
  func.func @transform_6(%arg0: i32, %arg1: i32) -> (i32, i32) {
    %c0_i32 = arith.constant 0 : i32
    %c0_i32_0 = arith.constant 0 : i32
    %c0_i32_1 = arith.constant 0 : i32
    return %c0_i32, %c0_i32_0 : i32, i32
  }
  func.func @transform_7(%arg0: i32, %arg1: i32) -> (i32, i32) {
    %c0_i32 = arith.constant 0 : i32
    %c0_i32_0 = arith.constant 0 : i32
    %c0_i32_1 = arith.constant 0 : i32
    return %c0_i32, %c0_i32_0 : i32, i32
  }
  func.func @transform_8(%arg0: i32, %arg1: i32) -> (i32, i32) {
    %c0_i32 = arith.constant 0 : i32
    %c0_i32_0 = arith.constant 0 : i32
    %c0_i32_1 = arith.constant 0 : i32
    return %c0_i32, %c0_i32_0 : i32, i32
  }
  func.func @transform_9(%arg0: i32, %arg1: i32) -> (i32, i32, i32, i32) {
    %c0_i32 = arith.constant 0 : i32
    %c0_i32_0 = arith.constant 0 : i32
    %c0_i32_1 = arith.constant 0 : i32
    return %arg0, %arg1, %c0_i32, %c0_i32_0 : i32, i32, i32, i32
  }
}

</mosaic_0001>

<bundles_post_ra>
// kernel: tpu_custom_call.1
= control target key start
LH: loop header
LB: loop body
LE: loop exit
PB: predicated region body
PF: predicated region fallthrough
CT: control target
= control target key end

     0   :  { %14 = vsyncpa [#allocation3], 0  ;;  %s4840_s0 = inlined_call_operand.vmem [shape: bf16[2,18,16,16], index: 0, kind: input, shape index: {}]   ;;  %s4841_s1 = inlined_call_operand.vmem [shape: bf16[16,8], index: 1, kind: input, shape index: {}]   ;;  %s4842_s2 = inlined_call_operand.vmem [shape: bf16[3,24,8], index: 2, kind: input, shape index: {}]   ;;  %s4843_s3 = inlined_call_operand.vmem [shape: bf16[8,32], index: 3, kind: input, shape index: {}]   ;;  %s4844_s4 = inlined_call_operand.vmem [shape: f32[1,8], index: 4, kind: input, shape index: {}]   ;;  %s4845_s5 = inlined_call_operand.vmem [shape: f32[1,8], index: 5, kind: input, shape index: {}]   ;;  %s4846_s6 = inlined_call_operand.vmem [shape: f32[1,32], index: 6, kind: input, shape index: {}]   ;;  %s4847_s7 = inlined_call_operand.vmem [shape: bf16[16,32], index: 7, kind: input, shape index: {}]   ;;  %s4848_s8 = inlined_call_operand.vmem [shape: f32[1,32], index: 8, kind: input, shape index: {}]   ;;  %s4849_s9 = inlined_call_operand.hbm [shape: f32[2,16,16,32], index: 9, kind: output, shape index: {}]  }
   0x1   :  { %16 = vsyncpa [#allocation3 + $0x1], 0  ;;  %s3215_s30 = smov 0   ;;  %s3217_s10 = smov 0  }
   0x2   :  { %s3219_s11 = smov 0   ;;  %s3221_s12 = smov 0  }
   0x3   :  { %s3223_s13 = smov 0   ;;  %s3225_s14 = smov 0  }
   0x4   :  { %s3227_s15 = smov 0   ;;  %s3229_s16 = smov 0  }
   0x5 LB: > { %s2433_s17 = sadd.s32 4294967295, %s3159_s16   ;;  %s2434_s18 = sadd.s32 4294967294, %s3159_s16   ;;  %s3159_s16 = sphi %s3229_s16, %s22_s16   ;;  %s3155_s15 = sphi %s3227_s15, %s5134_s15   ;;  %s3151_s14 = sphi %s3225_s14, %s5133_s14   ;;  %s3147_s13 = sphi %s3223_s13, %s5132_s13   ;;  %s3143_s12 = sphi %s3221_s12, %s5131_s12   ;;  %s3139_s11 = sphi %s3219_s11, %s5130_s11   ;;  %s3135_s10 = sphi %s3217_s10, %s5129_s10   ;;  %s3131_s30 = sphi %s3215_s30, %s5128_s30  }
   0x6   : > { %s31_s19 = sadd.s32 1, %s3151_s14  ;;  %s34_s20 = sadd.s32 1, %s3155_s15 }
   0x7   : > { %p32_p0 = scmp.ge.s32.totalorder %s31_s19, 2  ;;  %p247_p1 = scmp.ne.s32.totalorder %s3139_s11, %s3135_s10 }
   0x8   : > { %p248_p2 = scmp.eq.s32.totalorder %s2433_s17, 3  ;;  %p253_p5 = scmp.ne.s32.totalorder %s3135_s10, %s3131_s30 }
   0x9   : > { %s5136_s19 = smov (%p32_p0, %s31_s19), 0  ;;  %s5138_s20 = smov (!%p32_p0, %s34_s20), %s3155_s15 }
   0xa   : > { %4878 = sst [smem:[#allocation5_spill]] %s5136_s19  ;;  %s233_s21 = ssub.s32 %s3151_s14, %s5136_s19 }
   0xb   : > { %p3266_p3 = por %p248_p2, %p247_p1  ;;  %p36_p4 = scmp.ge.s32.totalorder %s5138_s20, 2 }
   0xc   : > { %p254_p6 = scmp.eq.s32.totalorder %s2434_s18, 3  ;;  %p2437_p7 = scmp.ge.s32.totalorder %s3159_s16, 1 }
   0xd   : > { %s5140_s20 = smov (%p36_p4, %s5138_s20), 0  ;;  %p304_p9 = scmp.lt.s32.totalorder %s3159_s16, 5 }
   0xe   : > { %4880 = sst [smem:[#allocation6_spill]] %s5140_s20  ;;  %p3275_p8 = por %p254_p6, %p253_p5 }
   0xf   : > { %s232_s24 = ssub.s32 %s3155_s15, %s5140_s20  ;;  %s237_s25 = sadd.s32 1, %s3139_s11 }
  0x10   : > { %s234_s26 = sor.u32 %s233_s21, %s232_s24  ;;  %p305_p10 = pnand %p2437_p7, %p304_p9 }
  0x11   : > { %p235_p11 = scmp.eq.s32.totalorder %s234_s26, 0 }
  0x12   : > { %308 = sbr.rel (%p305_p10) target bundleno = 980 (0x3d4), region = 56 }
  0x13   : > { %s3284_s27 = scalar_select %p235_p11, %s3139_s11, %s237_s25  }
  0x19   : > { %v3039_v0 = vld [vmem:[%s4841_s1] sm:$0xff]   ;;  %p340_p12 = scmp.lt.s32.totalorder %s3147_s13, 1  ;;  %s2531_s20 = sshll.u32 %s3143_s12, 6  ;;  %vm4852_vm0 = vcmask 130048   ;;  %v600_v11 = vlaneseq  ;;  %v4890_v51 = vmov 0  ;;  %v3050_v45 = vld [vmem:[%s4842_s2 + $0xc] sm:$0xff]  }
  0x1a   : > { %2592 = vmatprep.subr.bf16.mxu0 %v3039_v0  ;;  %s2440_s19 = sshll.u32 %s3143_s12, 3  ;;  %v3366_v26 = vld [vmem:[%s4844_s4] ss:$0 sm:$0xff]  ;;  %2614 = vmatprep.subr.bf16.mxu1 %v3050_v45 }
  0x1b   : > { %s341_s17 = scalar_select %p340_p12, %s3147_s13, 1  ;;  %2593 = vmatpush3.bf16.msra.mxu0 %v3039_v0  ;;  %v3318_v12 = vshrl.u32 %v600_v11, 7  ;;  %2615 = vmatpush3.bf16.msra.mxu1 %v3050_v45  ;;  %v3056_v41 = vld [vmem:[%s4847_s7] sm:$0xff]  }
  0x1c   : > { %s644_s26 = ssub.s32 17, %s2440_s19 }
  0x1d   : > { %s2794_s18 = smul.u32 144, %s341_s17  ;;  %s2466_s29 = sshll.u32 %s644_s26, 4  ;;  %v619_v13 = vadd.s32 144, %v3318_v12  ;;  %v620_v17 = vadd.s32 152, %v3318_v12  ;;  %v603_v19 = vadd.s32 16, %v3318_v12  ;;  %v3340_v20 = vadd.s32 24, %v3318_v12 }
  0x1e   : > { %v3323_v15 = vstv %s2466_s29  ;;  %v602_v21 = vadd.s32 8, %v3318_v12  ;;  %v3346_v22 = vadd.s32 48, %v3318_v12  ;;  %v3355_v23 = vadd.s32 32, %v3318_v12 }
  0x1f   : > { %s344_s24 = scalar_lea.vmem %s4840_s0, %s2794_s18  ;;  %vm665_vm2 = vcmp.lt.s32.totalorder %v619_v13, %v3323_v15  ;;  %vm666_vm5 = vcmp.lt.s32.totalorder %v620_v17, %v3323_v15  ;;  %vm649_vm8 = vcmp.lt.s32.totalorder %v603_v19, %v3323_v15  ;;  %vm647_vm10 = vcmp.lt.s32.totalorder %v3318_v12, %v3323_v15  ;;  %s337_s18 = sand.u32 1, %s3135_s10  }
  0x20   : > { %s3295_s25 = scalar_lea.vmem %s344_s24, %s2531_s20  ;;  %s621_s20 = ssub.s32 1, %s2440_s19  ;;  %vm650_vm12 = vcmp.lt.s32.totalorder %v3340_v20, %v3323_v15  ;;  %v3361_v24 = vadd.s32 56, %v3318_v12  ;;  %v718_v25 = vand.u32 15, %v602_v21  ;;  %vm648_vm14 = vcmp.lt.s32.totalorder %v602_v21, %v3323_v15 }
  0x21   : > { %v3040_v1 = vld [vmem:[%s3295_s25] sm:$0xff]   ;;  %v3041_v2 = vld [vmem:[%s3295_s25 + $0x8] sm:$0xff]   ;;  %v3042_v3 = vld [vmem:[%s3295_s25 + $0x10] sm:$0xff]   ;;  %s2465_s28 = sshll.u32 %s621_s20, 4  ;;  %v3370_v27 = vadd.s32 40, %v3318_v12  ;;  %v732_v28 = vand.u32 15, %v3340_v20 }
  0x22   : > { %2594 = vmatprep.mubr.msk.bf16.mxu0 %vm4852_vm0, %v3040_v1  ;;  %v3043_v4 = vld [vmem:[%s3295_s25 + $0x18] sm:$0xff]   ;;  %v3044_v5 = vld [vmem:[%s3295_s25 + $0x20] sm:$0xff]   ;;  %v3045_v6 = vld [vmem:[%s3295_s25 + $0x28] sm:$0xff]   ;;  %v3321_v14 = vstv %s2465_s28  ;;  %v725_v29 = vand.u32 15, %v603_v19  ;;  %v3379_v30 = vadd.s32 80, %v3318_v12  ;;  %v3382_v31 = vadd.s32 64, %v3318_v12 }
  0x23   : > { %2595 = vmatmul.mubr.msk.bf16.vlgmr.msra.gmra.mrb[0].mxu0 %vm4852_vm0, %v3041_v2  ;;  %v3046_v7 = vld [vmem:[%s3295_s25 + $0x30] sm:$0xff]   ;;  %v3047_v8 = vld [vmem:[%s3295_s25 + $0x38] sm:$0xff]   ;;  %v3048_v9 = vld [vmem:[%s3295_s25 + $0x40] sm:$0xff]   ;;  %vm642_vm1 = vcmp.ge.s32.totalorder %v619_v13, %v3321_v14  ;;  %vm643_vm4 = vcmp.ge.s32.totalorder %v620_v17, %v3321_v14  ;;  %vm626_vm7 = vcmp.ge.s32.totalorder %v603_v19, %v3321_v14  ;;  %vm624_vm9 = vcmp.ge.s32.totalorder %v3318_v12, %v3321_v14  ;;  %s4877_s19 = smov 8   ;;  %s3162_s20 = smov 16  }
  0x24   : > { %2598 = vmatprep.mubr.msk.bf16.mxu0 %vm4852_vm0, %v3042_v3  ;;  %v3049_v10 = vld [vmem:[%s3295_s25 + $0x48] sm:$0xff]   ;;  %vm3327_vm3 = vmand %vm642_vm1, %vm665_vm2  ;;  %vm627_vm11 = vcmp.ge.s32.totalorder %v3340_v20, %v3321_v14  ;;  %vm625_vm13 = vcmp.ge.s32.totalorder %v602_v21, %v3321_v14  ;;  %vm630_vm15 = vcmp.ge.s32.totalorder %v3346_v22, %v3321_v14  ;;  %vm653_vm1 = vcmp.lt.s32.totalorder %v3346_v22, %v3323_v15  ;;  %s2438_s21 = sshll.u32 %s337_s18, 7  ;;  %s2532_s24 = sshll.u32 %s3143_s12, 4 }
  0x25   : > { %vm3334_vm6 = vmand %vm643_vm4, %vm666_vm5  ;;  %v3385_v32 = vadd.s32 88, %v3318_v12  ;;  %v3388_v33 = vadd.s32 72, %v3318_v12  ;;  %v3396_v35 = vadd.s32 112, %v3318_v12  ;;  %v3399_v36 = vadd.s32 96, %v3318_v12 }
  0x26   : > { %v746_v37 = vand.u32 15, %v3370_v27  ;;  %v760_v38 = vand.u32 15, %v3361_v24  ;;  %v3413_v42 = vadd.s32 120, %v3318_v12  ;;  %v3416_v43 = vadd.s32 104, %v3318_v12  ;;  %vm3423_vm2 = vmand %vm626_vm7, %vm649_vm8 }
  0x27   : > { %v774_v44 = vand.u32 15, %v3388_v33  ;;  %vm652_vm4 = vcmp.lt.s32.totalorder %v3370_v27, %v3323_v15  ;;  %v3433_v48 = vadd.s32 128, %v3318_v12  ;;  %v3436_v49 = vadd.s32 136, %v3318_v12  ;;  %vm667_vm8 = vmand %vm624_vm9, %vm647_vm10 }
  0x28   : > { %vm3439_vm7 = vcmp.ne.s32.totalorder %v725_v29, 0  ;;  %vm3458_vm5 = vmand %vm627_vm11, %vm650_vm12  ;;  %vm634_vm10 = vcmp.ge.s32.totalorder %v3379_v30, %v3321_v14  ;;  %vm657_vm11 = vcmp.lt.s32.totalorder %v3379_v30, %v3323_v15 }
  0x29   : > { %v4891_v51 = vsel %vm3439_vm7, 4294967295, %v4890_v51  ;;  %vm668_vm9 = vmand %vm625_vm13, %vm648_vm14  ;;  %vm655_vm13 = vcmp.lt.s32.totalorder %v3382_v31, %v3323_v15  ;;  %vm4902_vm14 = vcmp.ge.s32.totalorder %v3355_v23, %v3321_v14 }
  0x2b   : > { %2599 = vmatmul.mubr.msk.bf16.gmra.mrb[4].mxu0 %vm4852_vm0, %v3043_v4 }
  0x2c   : > { %2602 = vmatprep.mubr.msk.bf16.mxu0 %vm4852_vm0, %v3044_v5 }
  0x33   : > { %2603 = vmatmul.mubr.msk.bf16.gmra.mrb[8].mxu0 %vm4852_vm0, %v3045_v6 }
  0x34   : > { %2606 = vmatprep.mubr.msk.bf16.mxu0 %vm4852_vm0, %v3046_v7 }
  0x3b   : > { %2607 = vmatmul.mubr.msk.bf16.gmra.mrb[12].mxu0 %vm4852_vm0, %v3047_v8 }
  0x3c   : > { %2610 = vmatprep.mubr.msk.bf16.mxu0 %vm4852_vm0, %v3048_v9 }
  0x43   : > { %2611 = vmatmul.mubr.msk.bf16.gmra.mrb[16].mxu0 %vm4852_vm0, %v3049_v10  ;;  %vm3408_vm0 = vcmp.ne.s32.totalorder %v718_v25, 15 }
  0xf6   : > { %v2596_v34 = vpop.f32.mrb[0].mxu0 }
  0xf7   : > { %v510_v39 = vadd.f32 %v2596_v34, %v3366_v26  ;;  %v501_v40 = vpop.f32.mrb[1].mxu0 }
  0xf8   : > { %v502_v46 = vadd.f32 %v3366_v26, %v501_v40  ;;  %v2597_v47 = vpop.f32.mrb[2].mxu0 }
  0xf9   : > { %v582_v52 = vmax.f32 %v510_v39, 0.0  ;;  %v513_v53 = vadd.f32 %v2597_v47, %v3366_v26  ;;  %v504_v54 = vpop.f32.mrb[3].mxu0 }
  0xfa   : > { %v580_v57 = vmax.f32 %v502_v46, 0.0  ;;  %v505_v59 = vadd.f32 %v3366_v26, %v504_v54 }
  0xfb   : > { %v689_v62 = vsel %vm3423_vm2, %v582_v52, 0.0  ;;  %v583_v63 = vmax.f32 %v513_v53, 0.0 }
  0xfc   : > { %v3473_v2 = vsel %vm667_vm8, %v580_v57, 0.0  ;;  %v581_v3 = vmax.f32 %v505_v59, 0.0  ;;  %v3477_v6 = vrot.slane %v689_v62, 7  ;;  %v3479_v7 = vrot.slane %v689_v62, 1  ;;  %vm3524_vm8 = vmand %vm630_vm15, %vm653_vm1 }
  0xfd   : > { %v4854_v8 = vrot.slane %v3473_v2, 1  ;;  %v3484_v9 = vsel %vm3458_vm5, %v583_v63, 0.0  ;;  %vm3508_vm5 = vcmp.ne.s32.totalorder %v732_v28, 15  ;;  %v4853_v46 = vrot.slane %v3473_v2, 7 }
  0xfe   : > { %v934_v10 = vrot.slane %v3484_v9, 7  ;;  %v1015_v11 = vrot.slane %v3484_v9, 1  ;;  %v3492_v13 = vsel %vm668_vm9, %v581_v3, 0.0  ;;  %v2600_v17 = vpop.f32.mrb[4].mxu0  ;;  %v2869_v19 = vpack.i.bf16 %v3484_v9, %v689_v62 }
  0xff   : > { %v932_v21 = vrot.slane %v3492_v13, 7  ;;  %v1013_v25 = vrot.slane %v3492_v13, 1  ;;  %v526_v29 = vadd.f32 %v2600_v17, %v3366_v26  ;;  %v517_v34 = vpop.f32.mrb[5].mxu0  ;;  %vm4898_vm15 = vcmp.lt.s32.totalorder %v3318_v12, 7 }
 0x100   : > { %v518_v28 = vadd.f32 %v3366_v26, %v517_v34  ;;  %2870 = vrot.lane.b32.xlu0 %v2869_v19, %s4877_s19  ;;  %v2601_v47 = vpop.f32.mrb[6].mxu0  ;;  %v3539_v52 = vsel %vm4898_vm15, %v3479_v7, %v1015_v11  ;;  %vm4899_vm1 = vcmp.lt.s32.totalorder %v3318_v12, 1  ;;  %vm4901_vm9 = vcmp.lt.s32.totalorder %v3355_v23, %v3323_v15 }
 0x101   : > { %v3546_v53 = vsel %vm4899_vm1, %v3477_v6, %v934_v10  ;;  %v586_v54 = vmax.f32 %v526_v29, 0.0  ;;  %vm3554_vm2 = vmand %vm4902_vm14, %vm4901_vm9  ;;  %v529_v58 = vadd.f32 %v2601_v47, %v3366_v26  ;;  %v520_v59 = vpop.f32.mrb[7].mxu0  ;;  %v1042_v62 = vsel %vm4898_vm15, %v1013_v25, %v3479_v7 }
 0x102   : > { %4900 = vst [vmem:[#allocation7_spill] sm:$0xff] %v3546_v53  ;;  %vm4905_vm1 = vmmov %vm4898_vm15  ;;  %v584_v3 = vmax.f32 %v518_v28, 0.0  ;;  %vm4906_vm14 = vcmp.lt.s32.totalorder %v3361_v24, %v3323_v15  ;;  %vm4907_vm9 = vcmp.ge.s32.totalorder %v3361_v24, %v3321_v14  ;;  %v521_v19 = vadd.f32 %v3366_v26, %v520_v59 }
 0x103   : > { %v1043_v63 = vsel %vm4905_vm1, %v4854_v8, %v1013_v25  ;;  %vm3572_vm12 = vmand %vm4907_vm9, %vm4906_vm14  ;;  %v1078_v29 = vsel %vm3408_vm0, %v1042_v62, 0.0  ;;  %vm4910_vm15 = vcmp.lt.s32.totalorder %v3318_v12, 1  ;;  %v3586_v34 = vsel %vm3524_vm8, %v586_v54, 0.0 }
 0x104   : > { %v3582_v25 = vsel %vm4910_vm15, %v932_v21, %v3477_v6  ;;  %v587_v28 = vmax.f32 %v529_v58, 0.0  ;;  %vm4912_vm1 = vcmp.ge.s32.totalorder %v3370_v27, %v3321_v14  ;;  %v3594_v47 = vpack.i.bf16 %v1078_v29, %v1043_v63 }
 0x105   : > { %4911 = vst [vmem:[#allocation8_spill] sm:$0xff] %v3582_v25  ;;  %vm672_vm14 = vmand %vm4912_vm1, %vm652_vm4  ;;  %v4855_v45 = vrot.slane %v3586_v34, 7  ;;  %v691_v20 = vsel %vm3554_vm2, %v584_v3, 0.0  ;;  %v585_v54 = vmax.f32 %v521_v19, 0.0  ;;  %vm638_vm4 = vcmp.ge.s32.totalorder %v3396_v35, %v3321_v14 }
 0x106   : > { %4913 = vst [vmem:[#allocation9_spill] sm:$0xff] %v3594_v47  ;;  %v3603_v62 = vrot.slane %v691_v20, 7  ;;  %v3605_v40 = vrot.slane %v691_v20, 1  ;;  %v3609_v63 = vsel %vm3572_vm12, %v587_v28, 0.0  ;;  %vm661_vm8 = vcmp.lt.s32.totalorder %v3396_v35, %v3323_v15  ;;  %vm4914_vm2 = vmmov %vm4910_vm15  ;;  %v2604_v17 = vpop.f32.mrb[8].mxu0 }
 0x107   : > { %v3619_v57 = vsel %vm4914_vm2, %v4853_v46, %v932_v21  ;;  %v1018_v3 = vrot.slane %v3586_v34, 1  ;;  %v1019_v19 = vrot.slane %v3609_v63, 1  ;;  %v3623_v29 = vsel %vm672_vm14, %v585_v54, 0.0  ;;  %v533_v58 = vpop.f32.mrb[9].mxu0  ;;  %vm3645_vm14 = vmand %vm634_vm10, %vm657_vm11 }
 0x108   : > { %4915 = vst [vmem:[#allocation10_spill] sm:$0xff] %v3619_v57  ;;  %v2879_v28 = vpack.i.bf16 %v3609_v63, %v3586_v34  ;;  %vm659_vm9 = vcmp.lt.s32.totalorder %v3399_v36, %v3323_v15  ;;  %v4856_v59 = vrot.slane %v3623_v29, 7  ;;  %v1017_v21 = vrot.slane %v3623_v29, 1  ;;  %v2605_v4 = vpop.f32.mrb[10].mxu0 }
 0x109   : > { %v542_v46 = vadd.f32 %v2604_v17, %v3366_v26  ;;  %v2874_v54 = vpack.i.bf16 %v3623_v29, %v691_v20  ;;  %v534_v17 = vadd.f32 %v3366_v26, %v533_v58  ;;  %vm4918_vm2 = vcmp.lt.s32.totalorder %v3318_v12, 7  ;;  %v536_v1 = vpop.f32.mrb[11].mxu0 }
 0x10a   : > { %v1040_v20 = vsel %vm4918_vm2, %v1015_v11, %v3605_v40  ;;  %vm3661_vm10 = vcmp.ne.s32.totalorder %v746_v37, 15  ;;  %vm4921_vm11 = vmmov %vm4918_vm2  ;;  %v537_v0 = vadd.f32 %v3366_v26, %v536_v1  ;;  %v4858_v5 = vrot.slane %v3609_v63, 7 }
 0x10b   : > { %v3669_v58 = vsel %vm4921_vm11, %v1018_v3, %v1019_v19  ;;  %vm4922_vm2 = vmmov %vm4910_vm15  ;;  %v590_v37 = vmax.f32 %v542_v46, 0.0  ;;  %vm4924_vm11 = vcmp.ge.s32.totalorder %v3382_v31, %v3321_v14  ;;  %2875 = vrot.lane.b32.xlu0 %v2874_v54, %s4877_s19  ;;  %v1080_v54 = vsel %vm3508_vm5, %v1040_v20, 0.0 }
 0x10c   : > { %v3676_v11 = vsel %vm4922_vm2, %v934_v10, %v3603_v62  ;;  %vm4923_vm15 = vmmov %vm4922_vm2  ;;  %v545_v10 = vadd.f32 %v2605_v4, %v3366_v26  ;;  %vm4928_vm2 = vcmp.ge.s32.totalorder %v3385_v32, %v3321_v14  ;;  %v3729_v1 = vpack.i.bf16 %v1080_v54, %v3539_v52 }
 0x10d   : > { %v3684_v27 = vsel %vm4923_vm15, %v4856_v59, %v4855_v45  ;;  %vm3692_vm1 = vmand %vm4924_vm11, %vm655_vm13  ;;  %v1292_v45 = vsel %vm3408_vm0, %v1040_v20, 0.0  ;;  %v588_v59 = vmax.f32 %v534_v17, 0.0  ;;  %vm4927_vm15 = vcmp.lt.s32.totalorder %v3385_v32, %v3323_v15 }
 0x10e   : > { %vm3706_vm12 = vmand %vm4928_vm2, %vm4927_vm15  ;;  %v2884_v4 = vpack.i.bf16 %v1292_v45, %v3539_v52  ;;  %v3716_v17 = vsel %vm3645_vm14, %v590_v37, 0.0  ;;  %v591_v61 = vmax.f32 %v545_v10, 0.0  ;;  %vm4932_vm13 = vcmp.lt.s32.totalorder %v3388_v33, %v3323_v15  ;;  %v2608_v9 = vpop.f32.mrb[12].mxu0 }
 0x10f   : > { %4931 = vst [vmem:[#allocation11_spill] sm:$0xff] %v3716_v17  ;;  %vm4933_vm11 = vcmp.ge.s32.totalorder %v3388_v33, %v3321_v14  ;;  %vm4936_vm2 = vcmp.lt.s32.totalorder %v3318_v12, 7  ;;  %v4859_v20 = vrot.slane %v3716_v17, 7  ;;  %v3739_v37 = vsel %vm3692_vm1, %v588_v59, 0.0  ;;  %2880 = vrot.lane.b32.xlu0 %v2879_v28, %s4877_s19 }
 0x110   : > { %vm3724_vm15 = vmand %vm4933_vm11, %vm4932_vm13  ;;  %v3733_v45 = vsel %vm4936_vm2, %v1017_v21, %v1018_v3  ;;  %4937 = vst [vmem:[#allocation12_spill] sm:$0xff] %v3739_v37  ;;  %v589_v10 = vmax.f32 %v537_v0, 0.0  ;;  %2885 = vrot.lane.b32.xlu1 %v2884_v4, %s3162_s20  ;;  %vm3744_vm14 = vcmp.ne.s32.totalorder %v760_v38, 15  ;;  %v4857_v3 = vrot.slane %v3739_v37, 7  ;;  %v549_v4 = vpop.f32.mrb[13].mxu0 }
 0x111   : > { %v1020_v54 = vrot.slane %v3739_v37, 1  ;;  %v3752_v56 = vsel %vm3706_vm12, %v591_v61, 0.0  ;;  %vm4941_vm1 = vmmov %vm4936_vm2  ;;  %v1294_v61 = vsel %vm3508_vm5, %v3733_v45, 0.0  ;;  %vm4943_vm11 = vcmp.lt.s32.totalorder %v3318_v12, 1  ;;  %v2609_v55 = vpop.f32.mrb[14].mxu0 }
 0x112   : > { %4940 = vst [vmem:[#allocation13_spill] sm:$0xff] %v3752_v56  ;;  %v3758_v0 = vsel %vm4941_vm1, %v3605_v40, %v1017_v21  ;;  %v3764_v59 = vsel %vm3724_vm15, %v589_v10, 0.0  ;;  %v3779_v60 = vsel %vm4943_vm11, %v4858_v5, %v4857_v3  ;;  %v558_v46 = vadd.f32 %v2608_v9, %v3366_v26  ;;  %vm3790_vm15 = vmand %vm638_vm4, %vm661_vm8  ;;  %v552_v50 = vpop.f32.mrb[15].mxu0 }
 0x113   : > { %4942 = vst [vmem:[#allocation14_spill] sm:$0xff] %v3764_v59  ;;  %4944 = vst [vmem:[#allocation15_spill] sm:$0xff] %v3779_v60  ;;  %v4860_v28 = vrot.slane %v3764_v59, 7  ;;  %v1021_v21 = vrot.slane %v3764_v59, 1  ;;  %v550_v3 = vadd.f32 %v3366_v26, %v549_v4  ;;  %v2889_v5 = vpack.i.bf16 %v1294_v61, %v3758_v0 }
 0x114   : > { %vm4947_vm2 = vmmov %vm4941_vm1  ;;  %v2894_v38 = vpack.i.bf16 %v3764_v59, %v3739_v37  ;;  %vm3810_vm1 = vcmp.ne.s32.totalorder %v774_v44, 15  ;;  %v594_v4 = vmax.f32 %v558_v46, 0.0  ;;  %v561_v44 = vadd.f32 %v2609_v55, %v3366_v26 }
 0x115   : > { %v3800_v9 = vsel %vm4947_vm2, %v1019_v19, %v1020_v54  ;;  %v3820_v19 = vsel %vm4943_vm11, %v4860_v28, %v4859_v20  ;;  %vm4951_vm2 = vcmp.ge.s32.totalorder %v3399_v36, %v3321_v14  ;;  %v592_v20 = vmax.f32 %v550_v3, 0.0  ;;  %2890 = vrot.lane.b32.xlu1 %v2889_v5, %s3162_s20 }
 0x116   : > { %4950 = vst [vmem:[#allocation16_spill] sm:$0xff] %v3820_v19  ;;  %vm3828_vm4 = vmand %vm4951_vm2, %vm659_vm9  ;;  %v1296_v24 = vsel %vm3661_vm10, %v3800_v9, 0.0  ;;  %vm4954_vm11 = vcmp.lt.s32.totalorder %v3413_v42, %v3323_v15  ;;  %vm4955_vm8 = vcmp.ge.s32.totalorder %v3413_v42, %v3321_v14  ;;  %v553_v55 = vadd.f32 %v3366_v26, %v552_v50 }
 0x117   : > { %vm3843_vm9 = vmand %vm4955_vm8, %vm4954_vm11  ;;  %v2899_v28 = vpack.i.bf16 %v1296_v24, %v3669_v58  ;;  %v2904_v57 = vpack.i.bf16 %v3752_v56, %v3716_v17  ;;  %v3853_v5 = vsel %vm3790_vm15, %v594_v4, 0.0  ;;  %v595_v3 = vmax.f32 %v561_v44, 0.0 }
 0x118   : > { %4958 = vst [vmem:[#allocation17_spill] sm:$0xff] %v3853_v5  ;;  %vm4959_vm2 = vcmp.lt.s32.totalorder %v3416_v43, %v3323_v15  ;;  %vm4960_vm8 = vcmp.ge.s32.totalorder %v3416_v43, %v3321_v14  ;;  %v4961_v25 = vrot.slane %v3716_v17, 1  ;;  %vm4962_vm12 = vcmp.lt.s32.totalorder %v3318_v12, 7 }
 0x119   : > { %vm680_vm11 = vmand %vm4960_vm8, %vm4959_vm2  ;;  %v1023_v10 = vrot.slane %v3752_v56, 1  ;;  %v3875_v44 = vsel %vm3828_vm4, %v592_v20, 0.0  ;;  %v593_v53 = vmax.f32 %v553_v55, 0.0  ;;  %2900 = vrot.lane.b32.xlu0 %v2899_v28, %s3162_s20  ;;  %v4965_v19 = vand.u32 15, %v3385_v32  ;;  %2895 = vrot.lane.b32.xlu1 %v2894_v38, %s4877_s19 }
 0x11a   : > { %v3865_v50 = vsel %vm4962_vm12, %v1021_v21, %v4961_v25  ;;  %vm4963_vm13 = vmmov %vm4962_vm12  ;;  %4964 = vst [vmem:[#allocation18_spill] sm:$0xff] %v3875_v44  ;;  %v702_v4 = vsel %vm3843_vm9, %v595_v3, 0.0  ;;  %v1026_v33 = vrot.slane %v3853_v5, 1  ;;  %v4969_v46 = vrot.slane %v3752_v56, 7 }
 0x11b   : > { %v3869_v24 = vsel %vm4963_vm13, %v1020_v54, %v1021_v21  ;;  %vm3880_vm15 = vcmp.ne.s32.totalorder %v4965_v19, 15  ;;  %v4867_v54 = vrot.slane %v3875_v44, 7  ;;  %v1024_v21 = vrot.slane %v3875_v44, 1  ;;  %v2612_v19 = vpop.f32.mrb[16].mxu0 }
 0x11c   : > { %v1298_v20 = vsel %vm3744_vm14, %v3865_v50, 0.0  ;;  %v3892_v28 = vrot.slane %v702_v4, 1  ;;  %v3894_v32 = vsel %vm680_vm11, %v593_v53, 0.0  ;;  %vm4970_vm12 = vcmp.lt.s32.totalorder %v3318_v12, 1  ;;  %v565_v37 = vpop.f32.mrb[17].mxu0 }
 0x11d   : > { %4968 = vst [vmem:[#allocation19_spill] sm:$0xff] %v3894_v32  ;;  %v2909_v55 = vpack.i.bf16 %v1298_v20, %v3869_v24  ;;  %v3904_v3 = vsel %vm4970_vm12, %v4969_v46, %v4867_v54  ;;  %v4870_v47 = vrot.slane %v3894_v32, 7  ;;  %v1025_v60 = vrot.slane %v3894_v32, 1  ;;  %2905 = vrot.lane.b32.xlu0 %v2904_v57, %s4877_s19  ;;  %v2613_v56 = vpop.f32.mrb[18].mxu0  ;;  %vm4979_vm2 = vmmov %vm4970_vm12 }
 0x11e   : > { %4971 = vst [vmem:[#allocation20_spill] sm:$0xff] %v3904_v3  ;;  %v574_v53 = vadd.f32 %v2612_v19, %v3366_v26  ;;  %v4972_v38 = vand.u32 15, %v3416_v43  ;;  %v566_v20 = vadd.f32 %v3366_v26, %v565_v37  ;;  %vm4975_vm4 = vcmp.lt.s32.totalorder %v3318_v12, 7  ;;  %v568_v3 = vpop.f32.mrb[19].mxu0 }
 0x11f   : > { %v3919_v46 = vsel %vm4975_vm4, %v1023_v10, %v1024_v21  ;;  %v4976_v54 = vrot.slane %v3716_v17, 1  ;;  %vm4977_vm9 = vmmov %vm4975_vm4  ;;  %v2914_v43 = vpack.i.bf16 %v3894_v32, %v3875_v44  ;;  %vm4981_vm8 = vcmp.lt.s32.totalorder %v3433_v48, %v3323_v15  ;;  %2910 = vrot.lane.b32.xlu1 %v2909_v55, %s3162_s20 }
 0x120   : > { %vm3911_vm13 = vcmp.ne.s32.totalorder %v4972_v38, 15  ;;  %v4978_v38 = vrot.slane %v3853_v5, 7  ;;  %v598_v37 = vmax.f32 %v574_v53, 0.0  ;;  %vm4982_vm11 = vcmp.ge.s32.totalorder %v3433_v48, %v3321_v14 }
 0x121   : > { %v3925_v19 = vsel %vm4977_vm9, %v4976_v54, %v1023_v10  ;;  %vm3943_vm12 = vmand %vm4982_vm11, %vm4981_vm8  ;;  %v577_v54 = vadd.f32 %v2613_v56, %v3366_v26  ;;  %v1300_v44 = vsel %vm3810_vm1, %v3919_v46, 0.0  ;;  %v569_v48 = vadd.f32 %v3366_v26, %v568_v3 }
 0x122   : > { %v3935_v57 = vsel %vm4979_vm2, %v4870_v47, %v4978_v38  ;;  %v4985_v38 = vand.u32 15, %v3413_v42  ;;  %v596_v47 = vmax.f32 %v566_v20, 0.0  ;;  %v2924_v56 = vpack.i.bf16 %v702_v4, %v3853_v5 }
 0x123   : > { %4980 = vst [vmem:[#allocation21_spill] sm:$0xff] %v3935_v57  ;;  %v2919_v57 = vpack.i.bf16 %v1300_v44, %v3925_v19  ;;  %v3963_v32 = vsel %vm3327_vm3, %v598_v37, 0.0  ;;  %v599_v17 = vmax.f32 %v577_v54, 0.0  ;;  %vm4988_vm9 = vcmp.lt.s32.totalorder %v3436_v49, %v3323_v15  ;;  %2915 = vrot.lane.b32.xlu1 %v2914_v43, %s4877_s19 }
 0x124   : > { %vm3953_vm4 = vcmp.ne.s32.totalorder %v4985_v38, 15  ;;  %vm4989_vm2 = vcmp.ge.s32.totalorder %v3436_v49, %v3321_v14  ;;  %vm4990_vm11 = vcmp.lt.s32.totalorder %v3318_v12, 7  ;;  %v3977_v44 = vrot.slane %v702_v4, 7 }
 0x125   : > { %vm684_vm8 = vmand %vm4989_vm2, %vm4988_vm9  ;;  %v3973_v42 = vsel %vm4990_vm11, %v1025_v60, %v1026_v33  ;;  %v3982_v55 = vsel %vm3943_vm12, %v596_v47, 0.0  ;;  %v597_v15 = vmax.f32 %v569_v48, 0.0  ;;  %2920 = vrot.lane.b32.xlu0 %v2919_v57, %s3162_s20  ;;  %v1712_v14 = vrot.slane %v3963_v32, 1 }
 0x126   : > { %vm4991_vm7 = vmmov %vm4990_vm11  ;;  %v1286_v49 = vrot.slane %v3982_v55, 1  ;;  %v3989_v3 = vsel %vm3334_vm6, %v599_v17, 0.0  ;;  %v4992_v57 = vand.u32 15, %v3355_v23  ;;  %v1084_v38 = vsel %vm3744_vm14, %v3800_v9, 0.0 }
 0x127   : > { %v1031_v26 = vsel %vm4991_vm7, %v1024_v21, %v1025_v60  ;;  %v1302_v60 = vsel %vm3880_vm15, %v3973_v42, 0.0  ;;  %v1713_v47 = vrot.slane %v3989_v3, 1  ;;  %v704_v21 = vsel %vm684_vm8, %v597_v15, 0.0  ;;  %vm4995_vm6 = vmmov %vm4991_vm7 }
 0x128   : > { %v2929_v20 = vpack.i.bf16 %v1302_v60, %v1031_v26  ;;  %vm3999_vm3 = vcmp.ne.s32.totalorder %v4992_v57, 0  ;;  %v4003_v18 = vrot.slane %v704_v21, 7  ;;  %v1287_v17 = vrot.slane %v704_v21, 1  ;;  %vm4996_vm7 = vmmov %vm4995_vm6 }
 0x129   : > { %v1029_v10 = vsel %vm4995_vm6, %v1026_v33, %v3892_v28  ;;  %v1289_v54 = vsel %vm4996_vm7, %v3892_v28, %v1286_v49  ;;  %2925 = vrot.lane.b32.xlu0 %v2924_v56, %s4877_s19  ;;  %v2934_v43 = vpack.i.bf16 %v704_v21, %v3982_v55  ;;  %v1082_v48 = vsel %vm3661_vm10, %v3733_v45, 0.0  ;;  %vm5000_vm9 = vmmov %vm4995_vm6 }
 0x12a   : > { %v1304_v23 = vsel %vm3911_vm13, %v1289_v54, 0.0  ;;  %v4997_v33 = vand.u32 15, %v3346_v22  ;;  %v1288_v60 = vsel %vm5000_vm9, %v1286_v49, %v1287_v17  ;;  %vm5001_vm2 = vmmov %vm4995_vm6  ;;  %v4033_v57 = vpack.i.bf16 %v1084_v38, %v3669_v58  ;;  %2930 = vrot.lane.b32.xlu1 %v2929_v20, %s3162_s20 }
 0x12b   : > { %v2939_v56 = vpack.i.bf16 %v1304_v23, %v1029_v10  ;;  %v1290_v21 = vsel %vm5001_vm2, %v1287_v17, %v3479_v7  ;;  %v1088_v23 = vsel %vm3880_vm15, %v3919_v46, 0.0  ;;  %v1086_v49 = vsel %vm3810_vm1, %v3865_v50, 0.0  ;;  %vm5010_vm6 = vmmov %vm5001_vm2 }
 0x12c   : > { %vm4023_vm12 = vcmp.ne.s32.totalorder %v4997_v33, 0  ;;  %v1306_v22 = vsel %vm3953_vm4, %v1290_v21, 0.0  ;;  %v4039_v33 = vpack.i.bf16 %v1082_v48, %v3758_v0  ;;  %v5003_v7 = vand.u32 15, %v3318_v12 }
 0x12d   : > { %v5006_v20 = vand.u32 15, %v3382_v31  ;;  %v2944_v48 = vpack.i.bf16 %v1306_v22, %v1288_v60  ;;  %v4060_v16 = vpack.i.bf16 %v1088_v23, %v3925_v19  ;;  %v4063_v4 = vpack.i.bf16 %v1086_v49, %v3869_v24  ;;  %2940 = vrot.lane.b32.xlu0 %v2939_v56, %s3162_s20 }
 0x12e   : > { %5002 = vst [vmem:[#allocation22_spill] sm:$0xff] %v4039_v33  ;;  %vm4049_vm8 = vcmp.ne.s32.totalorder %v5003_v7, 0  ;;  %v5009_v33 = vrot.slane %v3473_v2, 1  ;;  %v5011_v5 = vand.u32 15, %v3379_v30  ;;  %v1090_v23 = vsel %vm3911_vm13, %v3973_v42, 0.0  ;;  %2935 = vrot.lane.b32.xlu1 %v2934_v43, %s4877_s19 }
 0x12f   : > { %vm4055_vm11 = vcmp.ne.s32.totalorder %v5006_v20, 0  ;;  %v1720_v49 = vsel %vm3508_vm5, %v3800_v9, 0.0  ;;  %v1718_v30 = vsel %vm3408_vm0, %v3733_v45, 0.0  ;;  %v5017_v9 = vand.u32 15, %v3396_v35  ;;  %vm5021_vm0 = vmmov %vm5001_vm2 }
 0x130   : > { %v1044_v7 = vsel %vm5010_vm6, %v3892_v28, %v5009_v33  ;;  %vm4072_vm7 = vcmp.ne.s32.totalorder %v5011_v5, 0  ;;  %v5014_v5 = vand.u32 15, %v3399_v36  ;;  %v4096_v33 = vpack.i.bf16 %v1090_v23, %v1031_v26 }
 0x131   : > { %v1092_v22 = vsel %vm3953_vm4, %v1044_v7, 0.0  ;;  %v4099_v20 = vpack.i.bf16 %v1720_v49, %v3669_v58  ;;  %v4102_v39 = vpack.i.bf16 %v1718_v30, %v3758_v0  ;;  %vm4106_vm5 = vcmp.ne.s32.totalorder %v5017_v9, 0  ;;  %v5033_v30 = vld [vmem:[#allocation14_spill] sm:$0xff] }
 0x132   : > { %vm4090_vm9 = vcmp.ne.s32.totalorder %v5014_v5, 0  ;;  %v4094_v56 = vpack.i.bf16 %v1092_v22, %v1029_v10  ;;  %v1724_v36 = vsel %vm3744_vm14, %v3919_v46, 0.0  ;;  %v1722_v58 = vsel %vm3661_vm10, %v3865_v50, 0.0  ;;  %vm5022_vm10 = vmmov %vm5021_vm0  ;;  %2945 = vrot.lane.b32.xlu1 %v2944_v48, %s3162_s20  ;;  %v4193_v22 = vld [vmem:[%s4842_s2] sm:$0xff]  }
 0x133   : > { %v1728_v45 = vsel %vm3880_vm15, %v1289_v54, 0.0  ;;  %v1726_v35 = vsel %vm3810_vm1, %v3973_v42, 0.0  ;;  %v4123_v0 = vpack.i.bf16 %v1724_v36, %v3925_v19  ;;  %v4126_v43 = vpack.i.bf16 %v1722_v58, %v3869_v24  ;;  %vm5023_vm14 = vmmov %vm5021_vm0  ;;  %v5038_v58 = vld [vmem:[#allocation15_spill] sm:$0xff] }
 0x134   : > { %v4128_v7 = vpack.i.bf16 %v1728_v45, %v1029_v10  ;;  %v4130_v52 = vpack.i.bf16 %v1726_v35, %v1031_v26  ;;  %v5020_v8 = vpack.i.bf16 %v3492_v13, %v3473_v2  ;;  %v1715_v50 = vsel %vm5021_vm0, %v1287_v17, %v1712_v14 }
 0x135   : > { %v3024_v61 = vpack.i.bf16 %v3989_v3, %v3963_v32  ;;  %v1714_v25 = vsel %vm5022_vm10, %v1712_v14, %v1713_v47  ;;  %v1716_v24 = vsel %vm5023_vm14, %v1713_v47, %v3605_v40  ;;  %v1730_v46 = vsel %vm3911_vm13, %v1715_v50, 0.0  ;;  %v3051_v40 = vld [vmem:[%s4842_s2 + $0x14] ss:$0 sps:$4 sm:$0xff]  }
 0x136   : > { %2950 = vrot.lane.b32.xlu0 %v5020_v8, %s4877_s19  ;;  %v1732_v13 = vsel %vm3953_vm4, %v1716_v24, 0.0  ;;  %v5024_v19 = vrot.slane %v3623_v29, 7  ;;  %vm5025_vm1 = vcmp.lt.s32.totalorder %v3318_v12, 1  ;;  %v1000_v26 = vsel %vm3999_vm3, %v3676_v11, 0.0  ;;  %v5040_v50 = vld [vmem:[#allocation13_spill] sm:$0xff]  ;;  %v5042_v24 = vld [vmem:[#allocation11_spill] sm:$0xff] }
 0x137   : > { %v3029_v59 = vpack.i.bf16 %v1730_v46, %v1288_v60  ;;  %v3034_v53 = vpack.i.bf16 %v1732_v13, %v1714_v25  ;;  %vm5026_vm15 = vnez %v4891_v51  ;;  %v5027_v14 = vrot.slane %v3989_v3, 7  ;;  %vm5028_vm13 = vmmov %vm5025_vm1  ;;  %v2045_v12 = vld [vmem:[%s4843_s3] sm:$0xf] }
 0x138   : > { %v4154_v42 = vsel %vm5025_vm1, %v3603_v62, %v5024_v19  ;;  %v1272_v29 = vsel %vm5026_vm15, %v3676_v11, 0.0  ;;  %v5029_v10 = vrot.slane %v3609_v63, 7  ;;  %v5030_v54 = vrot.slane %v3586_v34, 7  ;;  %vm5031_vm4 = vmmov %vm5025_vm1  ;;  %v5045_v19 = vld [vmem:[#allocation16_spill] sm:$0xff] }
 0x139   : > { %v4171_v47 = vsel %vm5028_vm13, %v5027_v14, %v3603_v62  ;;  %v1002_v48 = vsel %vm4023_vm12, %v3684_v27, 0.0  ;;  %v1274_v62 = vsel %vm3999_vm3, %v3684_v27, 0.0  ;;  %v1265_v63 = vrot.slane %v3982_v55, 7  ;;  %vm5032_vm6 = vmmov %vm5025_vm1 }
 0x13a   : > { %v4182_v60 = vsel %vm5031_vm4, %v5030_v54, %v5029_v10  ;;  %2960 = vrot.lane.b32.xlu0 %v3729_v1, %s3162_s20  ;;  %vm1457_vm2 = vcmask 1043456   ;;  %v1269_v23 = vsel %vm5032_vm6, %v4003_v18, %v3477_v6  ;;  %v5034_v5 = vrot.slane %v5033_v30, 7  ;;  %v5035_v1 = vld [vmem:[#allocation12_spill] sm:$0xff]  ;;  %vm5037_vm0 = vmmov %vm5025_vm1  ;;  %v5039_v6 = vld [vmem:[#allocation9_spill] sm:$0xff] }
 0x13b   : > { %2790 = vmatprep.subr.msk.bf16.mxu1 %vm1457_vm2, %v3051_v40  ;;  %v1459_v49 = vsel %vm1457_vm2, %v3051_v40, 0  ;;  %v1270_v55 = vsel %vm4049_vm8, %v1269_v23, 0.0  ;;  %v5036_v9 = vrot.slane %v5035_v1, 7  ;;  %v1004_v45 = vsel %vm4055_vm11, %v5038_v58, 0.0  ;;  %2955 = vrot.lane.b32.xlu1 %v5039_v6, %s3162_s20  ;;  %vm5044_vm10 = vmmov %vm5037_vm0  ;;  %v5046_v54 = vld [vmem:[#allocation19_spill] sm:$0xff]  ;;  %v5051_v1 = vld [vmem:[#allocation20_spill] sm:$0xff] }
 0x13c   : > { %2617 = vmatpush3.bf16.msra.mxu1 %v1459_v49  ;;  %v1276_v35 = vsel %vm4023_vm12, %v5038_v58, 0.0  ;;  %v5041_v25 = vrot.slane %v5040_v50, 7  ;;  %v5043_v46 = vrot.slane %v5042_v24, 7  ;;  %v1006_v40 = vsel %vm4072_vm7, %v5045_v19, 0.0  ;;  %v5048_v49 = vld [vmem:[#allocation18_spill] sm:$0xff]  ;;  %vm5050_vm14 = vmmov %vm5037_vm0  ;;  %2793 = vmatprep.subr.msk.bf16.mxu0 %vm1457_vm2, %v2045_v12 }
 0x13d   : > { %v4215_v36 = vsel %vm5037_vm0, %v5036_v9, %v5034_v5  ;;  %2634 = vmatprep.subr.bf16.mxu1 %v4193_v22  ;;  %v1278_v14 = vsel %vm4055_vm11, %v5045_v19, 0.0  ;;  %v5047_v23 = vrot.slane %v5046_v54, 7  ;;  %v5049_v30 = vrot.slane %v5048_v49, 7  ;;  %vm5054_vm1 = vmmov %vm5037_vm0  ;;  %v5055_v54 = vld [vmem:[#allocation21_spill] sm:$0xff] }
 0x13e   : > { %v4234_v13 = vsel %vm5044_vm10, %v5043_v46, %v5041_v25  ;;  %v1008_v9 = vsel %vm4090_vm9, %v5051_v1, 0.0  ;;  %2970 = vrot.lane.b32.xlu0 %v4033_v57, %s3162_s20  ;;  %v1280_v6 = vsel %vm4072_vm7, %v5051_v1, 0.0  ;;  %v5052_v25 = vld [vmem:[#allocation17_spill] sm:$0xff]  ;;  %v1282_v57 = vsel %vm4090_vm9, %v5055_v54, 0.0  ;;  %vm5056_vm13 = vmmov %vm5037_vm0 }
 0x13f   : > { %v4252_v5 = vsel %vm5050_vm14, %v5049_v30, %v5047_v23  ;;  %v5053_v24 = vrot.slane %v5052_v25, 7  ;;  %v1010_v23 = vsel %vm4106_vm5, %v5055_v54, 0.0  ;;  %v4284_v30 = vsel %vm5056_vm13, %v1265_v63, %v4003_v18  ;;  %vm5057_vm4 = vmmov %vm5037_vm0 }
 0x140   : > { %v4289_v25 = vsel %vm5057_vm4, %v3977_v44, %v1265_v63  ;;  %v5059_v8 = vrot.slane %v3473_v2, 7  ;;  %vm5060_vm6 = vmmov %vm5037_vm0  ;;  %v5062_v17 = vrot.slane %v3963_v32, 7  ;;  %vm1221_vm14 = vcmask 64512  }
 0x141   : > { %v4270_v46 = vsel %vm5054_vm1, %v5053_v24, %v3977_v44  ;;  %v5058_v24 = vld [vmem:[#allocation22_spill] sm:$0xff]  ;;  %v1284_v50 = vsel %vm4106_vm5, %v4289_v25, 0.0  ;;  %vm5064_vm10 = vmmov %vm5037_vm0  ;;  %vm5066_vm1 = vcmask 130048   ;;  %vm1432_vm4 = vcmask 195584  }
 0x142   : > { %2965 = vrot.lane.b32.xlu1 %v5058_v24, %s3162_s20  ;;  %v4304_v10 = vsel %vm5060_vm6, %v3977_v44, %v5059_v8  ;;  %v5061_v24 = vrot.slane %v3989_v3, 7  ;;  %v5063_v49 = vmov %v5062_v17  ;;  %2980 = vrot.lane.b32.xlu0 %v4060_v16, %s3162_s20  ;;  %v2078_v16 = vsel %vm1457_vm2, %v2045_v12, 0  ;;  %vm5067_vm13 = vmmov %vm5066_vm1 }
 0x143   : > { %v996_v63 = vsel %vm4049_vm8, %v4304_v10, 0.0  ;;  %v4322_v2 = vsel %vm5064_vm10, %v4003_v18, %v5063_v49  ;;  %2675 = vmatpush3.bf16.msra.mxu0 %v2078_v16  ;;  %vm5068_vm6 = vmmov %vm5066_vm1  ;;  %v5101_v38 = vsel %vm4023_vm12, %v5045_v19, 0.0 }
 0x144   : > { %v4315_v34 = vsel %vm5037_vm0, %v5062_v17, %v5061_v24  ;;  %v1710_v44 = vsel %vm4106_vm5, %v4322_v2, 0.0  ;;  %vm5069_vm0 = vmmov %vm5066_vm1  ;;  %2692 = vmatprep.subr.bf16.mxu0 %v3056_v41 }
 0x145   : > { %vm5070_vm10 = vmmov %vm5069_vm0 }
 0x146   : > { %2975 = vrot.lane.b32.xlu1 %v4063_v4, %s3162_s20  ;;  %2990 = vrot.lane.b32.xlu0 %v4094_v56, %s3162_s20  ;;  %vm5105_vm12 = vmmov %vm5069_vm0 }
 0x147   : > { %vm5118_vm5 = vmmov %vm5069_vm0 }
 0x14a   : > { %2985 = vrot.lane.b32.xlu1 %v4096_v33, %s3162_s20  ;;  %3000 = vrot.lane.b32.xlu0 %v4099_v20, %s3162_s20 }
 0x14e   : > { %2995 = vrot.lane.b32.xlu1 %v4102_v39, %s3162_s20  ;;  %3010 = vrot.lane.b32.xlu0 %v4123_v0, %s3162_s20  ;;  %v5065_v39 = vld [vmem:[#allocation7_spill] sm:$0xff] }
 0x152   : > { %3005 = vrot.lane.b32.xlu1 %v4126_v43, %s3162_s20  ;;  %3020 = vrot.lane.b32.xlu0 %v4128_v7, %s3162_s20 }
 0x156   : > { %3015 = vrot.lane.b32.xlu1 %v4130_v52, %s3162_s20  ;;  %3030 = vrot.lane.b32.xlu0 %v3029_v59, %s3162_s20 }
 0x15a   : > { %3025 = vrot.lane.b32.xlu1 %v3024_v61, %s4877_s19 }
 0x15e   : > { %3035 = vrot.lane.b32.xlu1 %v3034_v53, %s3162_s20  ;;  %s2526_s20 = sshll.u32 %s3147_s13, 5 }
 0x15f   : > { %s2352_s26 = sadd.s32 %s2532_s24, %s2526_s20  ;;  %s3163_s20 = smov [#allocation2]  }
 0x160   : > { %s2527_s13 = sshll.u32 %s2352_s26, 7  ;;  %s3069_s26 = sshll.u32 %s3163_s20, 4  ;;  %s3070_s26 = int_to_ptr.vmem [resolvable:$false] %s3069_s26 }
 0x161   : > { %s4779_s17 = scalar_lea.hbm %s4849_s9, %s2527_s13  ;;  %s3071_s19 = scalar_lea.vmem %s3070_s26, 4096 }
 0x172   : > { %v4358_v4 = vpop.permute.xlu0 %2870 }
 0x173   : > { %v2873_v56 = vunpack.i.h.bf16 %v4358_v4  ;;  %v2872_v33 = vunpack.i.l.bf16 %v4358_v4 }
 0x175   : > { %v4364_v0 = vsel %vm1221_vm14, %v5065_v39, %v2873_v56  ;;  %v1379_v43 = vsel %vm1221_vm14, %v1270_v55, %v2872_v33 }
 0x17d   : > { %v2876_v18 = vpop.permute.xlu0 %2875 }
 0x17e   : > { %v2878_v59 = vunpack.i.h.bf16 %v2876_v18  ;;  %v4372_v53 = vunpack.i.l.bf16 %v2876_v18 }
 0x180   : > { %v4379_v55 = vsel %vm1221_vm14, %v4154_v42, %v2878_v59  ;;  %v1381_v18 = vsel %vm1221_vm14, %v1272_v29, %v4372_v53 }
 0x181   : > { %v2881_v7 = vpop.permute.xlu0 %2880 }
 0x182   : > { %v2886_v32 = vpop.permute.xlu1 %2885  ;;  %v2883_v8 = vunpack.i.h.bf16 %v2881_v7  ;;  %v4374_v49 = vunpack.i.l.bf16 %v2881_v7 }
 0x183   : > { %v2888_v3 = vunpack.i.h.bf16 %v2886_v32  ;;  %v2887_v20 = vunpack.i.l.bf16 %v2886_v32 }
 0x184   : > { %v1383_v42 = vsel %vm1221_vm14, %v1274_v62, %v4374_v49  ;;  %v1228_v10 = vsel %vm1221_vm14, %v1002_v48, %v4374_v49 }
 0x185   : > { %v1395_v52 = vsel %vm5066_vm1, %v1379_v43, %v2887_v20  ;;  %v1396_v61 = vsel %vm5067_vm13, %v4364_v0, %v2888_v3  ;;  %v4392_v43 = vsel %vm1221_vm14, %v4182_v60, %v2883_v8  ;;  %vm5071_vm1 = vmmov %vm5069_vm0 }
 0x186   : > { %v1411_v17 = vpack.c.bf16 %v1396_v61, %v1395_v52  ;;  %v3053_v52 = vld [vmem:[%s4842_s2 + $0x8] ss:$0 sps:$4 sm:$0xff]   ;;  %vm5072_vm13 = vmmov %vm5069_vm0 }
 0x187   : > { %v2891_v24 = vpop.permute.xlu1 %2890 }
 0x188   : > { %v2893_v12 = vunpack.i.h.bf16 %v2891_v24  ;;  %v2892_v16 = vunpack.i.l.bf16 %v2891_v24  ;;  %2618 = vmatprep.mubr.msk.bf16.mxu1 %vm1432_vm4, %v1411_v17 }
 0x18a   : > { %v1397_v32 = vsel %vm5068_vm6, %v1381_v18, %v2892_v16  ;;  %v1398_v3 = vsel %vm5069_vm0, %v4379_v55, %v2893_v12  ;;  %v1592_v18 = vsel %vm1457_vm2, %v3053_v52, 0  ;;  %vm5073_vm6 = vmmov %vm5069_vm0 }
 0x18b   : > { %v2901_v56 = vpop.permute.xlu0 %2900  ;;  %v1412_v29 = vpack.c.bf16 %v1398_v3, %v1397_v32  ;;  %v2896_v7 = vpop.permute.xlu1 %2895 }
 0x18c   : > { %v2903_v20 = vunpack.i.h.bf16 %v2901_v56  ;;  %v2902_v39 = vunpack.i.l.bf16 %v2901_v56  ;;  %v2898_v17 = vunpack.i.h.bf16 %v2896_v7  ;;  %v4406_v8 = vunpack.i.l.bf16 %v2896_v7  ;;  %v4418_v56 = vld [vmem:[%s4842_s2 + $0x18] sm:$0xff]  }
 0x18d   : > { %2619 = vmatmul.mubr.msk.bf16.vlgmr.msra.gmra.mrb[0].mxu1 %vm1432_vm4, %v1412_v29 }
 0x18e   : > { %v1399_v61 = vsel %vm5070_vm10, %v1383_v42, %v2902_v39  ;;  %v1400_v59 = vsel %vm5071_vm1, %v4392_v43, %v2903_v20  ;;  %2635 = vmatpush3.bf16.msra.mxu1 %v4193_v22  ;;  %v4422_v22 = vsel %vm1221_vm14, %v4215_v36, %v2898_v17  ;;  %v1385_v20 = vsel %vm1221_vm14, %v1276_v35, %v4406_v8  ;;  %vm5074_vm10 = vmmov %vm5069_vm0 }
 0x18f   : > { %v1413_v60 = vpack.c.bf16 %v1400_v59, %v1399_v61  ;;  %v2906_v24 = vpop.permute.xlu0 %2905  ;;  %2791 = vmatprep.subr.msk.bf16.mxu1 %vm1457_vm2, %v3053_v52  ;;  %vm5075_vm1 = vmmov %vm5069_vm0 }
 0x190   : > { %v2908_v62 = vunpack.i.h.bf16 %v2906_v24  ;;  %v4410_v12 = vunpack.i.l.bf16 %v2906_v24 }
 0x191   : > { %v2911_v16 = vpop.permute.xlu1 %2910  ;;  %2622 = vmatprep.mubr.msk.bf16.mxu1 %vm1432_vm4, %v1413_v60 }
 0x192   : > { %v2913_v32 = vunpack.i.h.bf16 %v2911_v16  ;;  %v2912_v3 = vunpack.i.l.bf16 %v2911_v16  ;;  %2637 = vmatpush3.bf16.msra.mxu1 %v1592_v18  ;;  %v4435_v36 = vsel %vm1221_vm14, %v4234_v13, %v2908_v62  ;;  %v1387_v35 = vsel %vm1221_vm14, %v1278_v14, %v4410_v12 }
 0x193   : > { %2654 = vmatprep.subr.bf16.mxu1 %v4418_v56  ;;  %v1232_v11 = vsel %vm1221_vm14, %v1006_v40, %v4410_v12  ;;  %v1230_v40 = vsel %vm1221_vm14, %v1004_v45, %v4406_v8 }
 0x194   : > { %v1401_v42 = vsel %vm5072_vm13, %v1385_v20, %v2912_v3  ;;  %v1402_v29 = vsel %vm5073_vm6, %v4422_v22, %v2913_v32  ;;  %vm5076_vm13 = vmmov %vm5069_vm0 }
 0x195   : > { %v1414_v61 = vpack.c.bf16 %v1402_v29, %v1401_v42  ;;  %v2916_v59 = vpop.permute.xlu1 %2915  ;;  %vm5077_vm6 = vmmov %vm5069_vm0 }
 0x196   : > { %v2918_v16 = vunpack.i.h.bf16 %v2916_v59  ;;  %v4447_v13 = vunpack.i.l.bf16 %v2916_v59 }
 0x197   : > { %v2921_v39 = vpop.permute.xlu0 %2920  ;;  %2623 = vmatmul.mubr.msk.bf16.gmra.mrb[4].mxu1 %vm1432_vm4, %v1414_v61 }
 0x198   : > { %v2923_v7 = vunpack.i.h.bf16 %v2921_v39  ;;  %v2922_v52 = vunpack.i.l.bf16 %v2921_v39  ;;  %v4455_v39 = vsel %vm1221_vm14, %v4252_v5, %v2918_v16  ;;  %v1389_v42 = vsel %vm1221_vm14, %v1280_v6, %v4447_v13 }
 0x19a   : > { %v1403_v60 = vsel %vm5069_vm0, %v1387_v35, %v2922_v52  ;;  %v1404_v17 = vsel %vm5074_vm10, %v4435_v36, %v2923_v7  ;;  %vm5078_vm10 = vmmov %vm5069_vm0 }
 0x19b   : > { %v1415_v24 = vpack.c.bf16 %v1404_v17, %v1403_v60  ;;  %v2926_v62 = vpop.permute.xlu0 %2925 }
 0x19c   : > { %v2928_v18 = vunpack.i.h.bf16 %v2926_v62  ;;  %v4450_v32 = vunpack.i.l.bf16 %v2926_v62  ;;  %v2931_v14 = vpop.permute.xlu1 %2930 }
 0x19d   : > { %2626 = vmatprep.mubr.msk.bf16.mxu1 %vm1432_vm4, %v1415_v24  ;;  %v2933_v3 = vunpack.i.h.bf16 %v2931_v14  ;;  %v2932_v20 = vunpack.i.l.bf16 %v2931_v14 }
 0x19e   : > { %v4468_v59 = vsel %vm1221_vm14, %v4270_v46, %v2928_v18  ;;  %v1391_v5 = vsel %vm1221_vm14, %v1282_v57, %v4450_v32  ;;  %v1236_v45 = vsel %vm1221_vm14, %v1010_v23, %v4450_v32  ;;  %v1234_v23 = vsel %vm1221_vm14, %v1008_v9, %v4447_v13 }
 0x19f   : > { %v2941_v29 = vpop.permute.xlu0 %2940  ;;  %v1405_v7 = vsel %vm5075_vm1, %v1389_v42, %v2932_v20  ;;  %v1406_v52 = vsel %vm5076_vm13, %v4455_v39, %v2933_v3  ;;  %vm5079_vm1 = vmmov %vm5069_vm0 }
 0x1a0   : > { %v2943_v35 = vunpack.i.h.bf16 %v2941_v29  ;;  %v2942_v61 = vunpack.i.l.bf16 %v2941_v29  ;;  %v1416_v6 = vpack.c.bf16 %v1406_v52, %v1405_v7  ;;  %v4476_v60 = vpop.permute.xlu1 %2935  ;;  %vm5082_vm13 = vmmov %vm5069_vm0 }
 0x1a1   : > { %v2938_v62 = vunpack.i.h.bf16 %v4476_v60  ;;  %v2937_v46 = vunpack.i.l.bf16 %v4476_v60 }
 0x1a2   : > { %v1407_v17 = vsel %vm5077_vm6, %v1391_v5, %v2942_v61  ;;  %v1408_v24 = vsel %vm5069_vm0, %v4468_v59, %v2943_v35  ;;  %2627 = vmatmul.mubr.msk.bf16.gmra.mrb[8].mxu1 %vm1432_vm4, %v1416_v6  ;;  %vm5083_vm6 = vmmov %vm5069_vm0 }
 0x1a3   : > { %v1417_v16 = vpack.c.bf16 %v1408_v24, %v1407_v17  ;;  %v4487_v20 = vsel %vm1221_vm14, %v4284_v30, %v2938_v62  ;;  %v1393_v42 = vsel %vm1221_vm14, %v1284_v50, %v2937_v46  ;;  %v5080_v30 = vld [vmem:[#allocation8_spill] sm:$0xff] }
 0x1a4   : > { %v2946_v14 = vpop.permute.xlu1 %2945  ;;  %v5081_v17 = vsel %vm5026_vm15, %v5080_v30, 0.0 }
 0x1a5   : > { %2630 = vmatprep.mubr.msk.bf16.mxu1 %vm1432_vm4, %v1417_v16  ;;  %v2948_v57 = vunpack.i.h.bf16 %v2946_v14  ;;  %v2947_v3 = vunpack.i.l.bf16 %v2946_v14  ;;  %v1224_v24 = vsel %vm1221_vm14, %v5081_v17, %v2872_v33 }
 0x1a7   : > { %v1409_v35 = vsel %vm5078_vm10, %v1393_v42, %v2947_v3  ;;  %v1410_v61 = vsel %vm5079_vm1, %v4487_v20, %v2948_v57  ;;  %v5084_v57 = vld [vmem:[#allocation10_spill] sm:$0xff]  ;;  %vm5085_vm10 = vmmov %vm5069_vm0 }
 0x1a8   : > { %v2951_v18 = vpop.permute.xlu0 %2950  ;;  %v1418_v16 = vpack.c.bf16 %v1410_v61, %v1409_v35  ;;  %vm5086_vm1 = vmmov %vm5069_vm0 }
 0x1a9   : > { %v2953_v29 = vunpack.i.h.bf16 %v2951_v18  ;;  %v2952_v7 = vunpack.i.l.bf16 %v2951_v18 }
 0x1aa   : > { %2631 = vmatmul.mubr.msk.bf16.gmra.mrb[12].mxu1 %vm1432_vm4, %v1418_v16 }
 0x1ab   : > { %v1222_v4 = vsel %vm1221_vm14, %v996_v63, %v2952_v7  ;;  %v1223_v42 = vsel %vm1221_vm14, %v5084_v57, %v2953_v29 }
 0x1ac   : > { %v2961_v52 = vpop.permute.xlu0 %2960 }
 0x1ad   : > { %v2963_v5 = vunpack.i.h.bf16 %v2961_v52  ;;  %v2962_v6 = vunpack.i.l.bf16 %v2961_v52  ;;  %v2956_v50 = vpop.permute.xlu1 %2955 }
 0x1ae   : > { %v2958_v14 = vunpack.i.h.bf16 %v2956_v50  ;;  %v2957_v3 = vunpack.i.l.bf16 %v2956_v50 }
 0x1af   : > { %v1241_v62 = vsel %vm5082_vm13, %v4364_v0, %v2963_v5  ;;  %v1240_v18 = vsel %vm5083_vm6, %v1224_v24, %v2962_v6  ;;  %vm5087_vm13 = vmmov %vm5069_vm0  ;;  %v1226_v24 = vsel %vm1221_vm14, %v1000_v26, %v4372_v53 }
 0x1b0   : > { %v1255_v52 = vpack.c.bf16 %v1241_v62, %v1240_v18  ;;  %v2971_v33 = vpop.permute.xlu0 %2970  ;;  %v1238_v35 = vsel %vm5069_vm0, %v1222_v4, %v2957_v3  ;;  %v1239_v0 = vsel %vm5085_vm10, %v1223_v42, %v2958_v14  ;;  %vm5088_vm6 = vmmov %vm5069_vm0  ;;  %v3055_v4 = vld [vmem:[%s4842_s2 + $0x20] ss:$0 sps:$4 sm:$0xff]  }
 0x1b1   : > { %v2973_v61 = vunpack.i.h.bf16 %v2971_v33  ;;  %v2972_v5 = vunpack.i.l.bf16 %v2971_v33  ;;  %v1254_v63 = vpack.c.bf16 %v1239_v0, %v1238_v35  ;;  %vm5089_vm10 = vmmov %vm5069_vm0 }
 0x1b3   : > { %v1245_v29 = vsel %vm5086_vm1, %v4392_v43, %v2973_v61  ;;  %v1244_v6 = vsel %vm5087_vm13, %v1228_v10, %v2972_v5  ;;  %2638 = vmatprep.mubr.msk.bf16.mxu1 %vm1432_vm4, %v1254_v63  ;;  %vm5090_vm1 = vmmov %vm5069_vm0 }
 0x1b4   : > { %v2966_v7 = vpop.permute.xlu1 %2965  ;;  %v1257_v16 = vpack.c.bf16 %v1245_v29, %v1244_v6  ;;  %v2981_v48 = vpop.permute.xlu0 %2980  ;;  %2639 = vmatmul.mubr.msk.bf16.vlgmr.msra.gmra.mrb[0].mxu1 %vm1432_vm4, %v1255_v52  ;;  %vm5091_vm13 = vmmov %vm5069_vm0  ;;  %v1883_v6 = vsel %vm1457_vm2, %v3055_v4, 0 }
 0x1b5   : > { %v2968_v30 = vunpack.i.h.bf16 %v2966_v7  ;;  %v2967_v17 = vunpack.i.l.bf16 %v2966_v7  ;;  %v2983_v18 = vunpack.i.h.bf16 %v2981_v48  ;;  %v2982_v14 = vunpack.i.l.bf16 %v2981_v48  ;;  %2655 = vmatpush3.bf16.msra.mxu1 %v4418_v56 }
 0x1b6   : > { %2792 = vmatprep.subr.msk.bf16.mxu1 %vm1457_vm2, %v3055_v4  ;;  %vm5094_vm2 = vmmov %vm5069_vm0 }
 0x1b7   : > { %v1243_v50 = vsel %vm5088_vm6, %v4379_v55, %v2968_v30  ;;  %v1242_v62 = vsel %vm5069_vm0, %v1226_v24, %v2967_v17  ;;  %v4549_v57 = vsel %vm5089_vm10, %v4435_v36, %v2983_v18  ;;  %v4552_v42 = vsel %vm5090_vm1, %v1232_v11, %v2982_v14  ;;  %vm5092_vm6 = vmmov %vm5069_vm0 }
 0x1b8   : > { %v1256_v3 = vpack.c.bf16 %v1243_v50, %v1242_v62  ;;  %v2976_v26 = vpop.permute.xlu1 %2975  ;;  %v1259_v0 = vpack.c.bf16 %v4549_v57, %v4552_v42  ;;  %v2991_v61 = vpop.permute.xlu0 %2990  ;;  %vm5093_vm10 = vmmov %vm5069_vm0 }
 0x1b9   : > { %v2978_v33 = vunpack.i.h.bf16 %v2976_v26  ;;  %v2977_v35 = vunpack.i.l.bf16 %v2976_v26  ;;  %v2993_v63 = vunpack.i.h.bf16 %v2991_v61  ;;  %v2992_v7 = vunpack.i.l.bf16 %v2991_v61  ;;  %vm5095_vm1 = vmmov %vm5069_vm0  ;;  %2657 = vmatpush3.bf16.msra.mxu1 %v1883_v6 }
 0x1ba   : > { %2642 = vmatprep.mubr.msk.bf16.mxu1 %vm1432_vm4, %v1256_v3  ;;  %v5096_v3 = vsel %vm5026_vm15, %v3684_v27, 0.0  ;;  %vm5100_vm15 = vmmov %vm5069_vm0 }
 0x1bb   : > { %v1247_v5 = vsel %vm5091_vm13, %v4422_v22, %v2978_v33  ;;  %v1246_v10 = vsel %vm5092_vm6, %v1230_v40, %v2977_v35  ;;  %v4578_v56 = vsel %vm5069_vm0, %v4468_v59, %v2993_v63  ;;  %v4581_v30 = vsel %vm5093_vm10, %v1236_v45, %v2992_v7  ;;  %vm5097_vm13 = vmmov %vm5069_vm0 }
 0x1bc   : > { %v1258_v52 = vpack.c.bf16 %v1247_v5, %v1246_v10  ;;  %v2986_v29 = vpop.permute.xlu1 %2985  ;;  %v1261_v48 = vpack.c.bf16 %v4578_v56, %v4581_v30  ;;  %v3001_v50 = vpop.permute.xlu0 %3000  ;;  %v1807_v26 = vsel %vm1221_vm14, %v5096_v3, %v4374_v49  ;;  %vm5098_vm6 = vmmov %vm5069_vm0  ;;  %v5099_v5 = vsel %vm4049_vm8, %v4171_v47, 0.0  ;;  %2643 = vmatmul.mubr.msk.bf16.gmra.mrb[4].mxu1 %vm1432_vm4, %v1257_v16 }
 0x1bd   : > { %v2988_v17 = vunpack.i.h.bf16 %v2986_v29  ;;  %v2987_v24 = vunpack.i.l.bf16 %v2986_v29  ;;  %v3003_v14 = vunpack.i.h.bf16 %v3001_v50  ;;  %v3002_v11 = vunpack.i.l.bf16 %v3001_v50  ;;  %vm5102_vm8 = vmmov %vm5069_vm0 }
 0x1be   : > { %v1805_v51 = vsel %vm1221_vm14, %v5099_v5, %v4372_v53  ;;  %2646 = vmatprep.mubr.msk.bf16.mxu1 %vm1432_vm4, %v1258_v52  ;;  %v1811_v47 = vsel %vm1221_vm14, %v5101_v38, %v4410_v12  ;;  %vm5103_vm10 = vmmov %vm5069_vm0  ;;  %v5104_v52 = vsel %vm3999_vm3, %v5038_v58, 0.0  ;;  %v5107_v50 = vsel %vm4072_vm7, %v5055_v54, 0.0 }
 0x1bf   : > { %v1251_v62 = vsel %vm5094_vm2, %v4455_v39, %v2988_v17  ;;  %v1250_v18 = vsel %vm5095_vm1, %v1234_v23, %v2987_v24  ;;  %v1824_v33 = vsel %vm5097_vm13, %v4392_v43, %v3003_v14  ;;  %v1823_v35 = vsel %vm5098_vm6, %v1807_v26, %v3002_v11  ;;  %vm5106_vm2 = vmmov %vm5069_vm0 }
 0x1c0   : > { %v1260_v9 = vpack.c.bf16 %v1251_v62, %v1250_v18  ;;  %v2996_v4 = vpop.permute.xlu1 %2995  ;;  %v1838_v10 = vpack.c.bf16 %v1824_v33, %v1823_v35  ;;  %v3011_v27 = vpop.permute.xlu0 %3010  ;;  %v1809_v15 = vsel %vm1221_vm14, %v5104_v52, %v4406_v8  ;;  %v1815_v37 = vsel %vm1221_vm14, %v5107_v50, %v4450_v32  ;;  %vm5108_vm3 = vmmov %vm5069_vm0 }
 0x1c1   : > { %v2998_v40 = vunpack.i.h.bf16 %v2996_v4  ;;  %v2997_v61 = vunpack.i.l.bf16 %v2996_v4  ;;  %v3013_v63 = vunpack.i.h.bf16 %v3011_v27  ;;  %v3012_v7 = vunpack.i.l.bf16 %v3011_v27  ;;  %vm5109_vm1 = vmmov %vm5069_vm0 }
 0x1c2   : > { %v5110_v11 = vsel %vm4055_vm11, %v5051_v1, 0.0  ;;  %vm5111_vm7 = vmmov %vm5069_vm0  ;;  %v5113_v1 = vsel %vm4090_vm9, %v4289_v25, 0.0 }
 0x1c3   : > { %v1822_v49 = vsel %vm5100_vm15, %v4379_v55, %v2998_v40  ;;  %v1821_v43 = vsel %vm5069_vm0, %v1805_v51, %v2997_v61  ;;  %v1828_v16 = vsel %vm5102_vm8, %v4435_v36, %v3013_v63  ;;  %v1827_v55 = vsel %vm5103_vm10, %v1811_v47, %v3012_v7  ;;  %vm5112_vm13 = vmmov %vm5069_vm0 }
 0x1c4   : > { %v1837_v53 = vpack.c.bf16 %v1822_v49, %v1821_v43  ;;  %v3006_v45 = vpop.permute.xlu1 %3005  ;;  %v1840_v17 = vpack.c.bf16 %v1828_v16, %v1827_v55  ;;  %v3021_v19 = vpop.permute.xlu0 %3020  ;;  %v1813_v31 = vsel %vm1221_vm14, %v5110_v11, %v4447_v13  ;;  %2647 = vmatmul.mubr.msk.bf16.gmra.mrb[8].mxu1 %vm1432_vm4, %v1259_v0  ;;  %v1817_v13 = vsel %vm1221_vm14, %v5113_v1, %v2937_v46  ;;  %vm5114_vm11 = vmmov %vm5069_vm0 }
 0x1c5   : > { %v3008_v29 = vunpack.i.h.bf16 %v3006_v45  ;;  %v3007_v6 = vunpack.i.l.bf16 %v3006_v45  ;;  %v3023_v23 = vunpack.i.h.bf16 %v3021_v19  ;;  %v3022_v36 = vunpack.i.l.bf16 %v3021_v19  ;;  %2650 = vmatprep.mubr.msk.bf16.mxu1 %vm1432_vm4, %v1260_v9  ;;  %vm5115_vm6 = vmmov %vm5069_vm0 }
 0x1c6   : > { %vm5116_vm9 = vmmov %vm5069_vm0 }
 0x1c7   : > { %v1826_v12 = vsel %vm5105_vm12, %v4422_v22, %v3008_v29  ;;  %v1825_v24 = vsel %vm5106_vm2, %v1809_v15, %v3007_v6  ;;  %v1832_v8 = vsel %vm5108_vm3, %v4468_v59, %v3023_v23  ;;  %v1831_v18 = vsel %vm5109_vm1, %v1815_v37, %v3022_v36  ;;  %vm5117_vm15 = vmmov %vm5069_vm0 }
 0x1c8   : > { %v1839_v62 = vpack.c.bf16 %v1826_v12, %v1825_v24  ;;  %v3016_v58 = vpop.permute.xlu1 %3015  ;;  %v1842_v3 = vpack.c.bf16 %v1832_v8, %v1831_v18  ;;  %v3031_v54 = vpop.permute.xlu0 %3030  ;;  %vm5120_vm8 = vmmov %vm5069_vm0  ;;  %vm2321_vm3 = vcmask 261120  }
 0x1c9   : > { %v3018_v14 = vunpack.i.h.bf16 %v3016_v58  ;;  %v3017_v22 = vunpack.i.l.bf16 %v3016_v58  ;;  %v3033_v26 = vunpack.i.h.bf16 %v3031_v54  ;;  %v3032_v21 = vunpack.i.l.bf16 %v3031_v54  ;;  %vm5121_vm10 = vmmov %vm5069_vm0 }
 0x1ca   : > { %vm5122_vm12 = vmmov %vm5069_vm0 }
 0x1cb   : > { %v1830_v32 = vsel %vm5111_vm7, %v4455_v39, %v3018_v14  ;;  %v1829_v59 = vsel %vm5112_vm13, %v1813_v31, %v3017_v22  ;;  %v1834_v0 = vsel %vm5114_vm11, %v4487_v20, %v3033_v26  ;;  %v1833_v39 = vsel %vm5115_vm6, %v1817_v13, %v3032_v21  ;;  %vm5124_vm2 = vmmov %vm5069_vm0 }
 0x1cc   : > { %v1841_v57 = vpack.c.bf16 %v1830_v32, %v1829_v59  ;;  %v3026_v42 = vpop.permute.xlu1 %3025  ;;  %v1843_v4 = vpack.c.bf16 %v1834_v0, %v1833_v39  ;;  %2651 = vmatmul.mubr.msk.bf16.gmra.mrb[12].mxu1 %vm1432_vm4, %v1261_v48 }
 0x1cd   : > { %v3028_v33 = vunpack.i.h.bf16 %v3026_v42  ;;  %v3027_v9 = vunpack.i.l.bf16 %v3026_v42  ;;  %2658 = vmatprep.mubr.msk.bf16.mxu1 %vm1432_vm4, %v1837_v53 }
 0x1cf   : > { %v1820_v28 = vsel %vm1221_vm14, %v4315_v34, %v3028_v33  ;;  %v1819_v25 = vsel %vm1221_vm14, %v1710_v44, %v3027_v9  ;;  %v2503_v34 = vld [vmem:[%s4845_s5] ss:$0 sm:$0xff] }
 0x1d0   : > { %v3036_v35 = vpop.permute.xlu1 %3035 }
 0x1d1   : > { %v3038_v40 = vunpack.i.h.bf16 %v3036_v35  ;;  %v3037_v61 = vunpack.i.l.bf16 %v3036_v35 }
 0x1d3   : > { %v1835_v60 = vsel %vm5116_vm9, %v1819_v25, %v3037_v61  ;;  %v1836_v46 = vsel %vm5117_vm15, %v1820_v28, %v3038_v40  ;;  %v3057_v61 = vld [vmem:[%s3295_s25 + $0x8] sm:$0xff]   ;;  %v3058_v28 = vld [vmem:[%s3295_s25 + $0x10] sm:$0xff]   ;;  %v3059_v25 = vld [vmem:[%s3295_s25 + $0x18] sm:$0xff]  }
 0x1d4   : > { %v1844_v20 = vpack.c.bf16 %v1836_v46, %v1835_v60  ;;  %2659 = vmatmul.mubr.msk.bf16.vlgmr.msra.gmra.mrb[0].mxu1 %vm1432_vm4, %v1838_v10  ;;  %v3060_v60 = vld [vmem:[%s3295_s25 + $0x20] sm:$0xff]   ;;  %v3061_v46 = vld [vmem:[%s3295_s25 + $0x28] sm:$0xff]  }
 0x1d5   : > { %2662 = vmatprep.mubr.msk.bf16.mxu1 %vm1432_vm4, %v1839_v62 }
 0x1dc   : > { %2663 = vmatmul.mubr.msk.bf16.gmra.mrb[4].mxu1 %vm1432_vm4, %v1840_v17 }
 0x1dd   : > { %2666 = vmatprep.mubr.msk.bf16.mxu1 %vm1432_vm4, %v1841_v57 }
 0x1e4   : > { %2667 = vmatmul.mubr.msk.bf16.gmra.mrb[8].mxu1 %vm1432_vm4, %v1842_v3 }
 0x1e5   : > { %2670 = vmatprep.mubr.msk.bf16.mxu1 %vm1432_vm4, %v1843_v4 }
 0x1ec   : > { %2671 = vmatmul.mubr.msk.bf16.gmra.mrb[12].mxu1 %vm1432_vm4, %v1844_v20  ;;  %vm5119_vm4 = vmmov %vm5069_vm0  ;;  %v3062_v20 = vld [vmem:[%s3295_s25 + $0x30] sm:$0xff]  }
 0x2a7   : > { %v2660_v2 = vpop.f32.mrb[0].mxu1 }
 0x2a8   : > { %v2007_v44 = vadd.f32 %v2660_v2, %v2503_v34  ;;  %v1919_v56 = vpop.f32.mrb[1].mxu1  ;;  %v2504_v2 = vld [vmem:[%s4846_s6] ss:$0 sm:$0xff] }
 0x2a9   : > { %v2005_v30 = vadd.f32 %v2503_v34, %v1919_v56  ;;  %v2661_v48 = vpop.f32.mrb[2].mxu1 }
 0x2aa   : > { %v2008_v5 = vadd.f32 %v2661_v48, %v2503_v34  ;;  %v1922_v51 = vpop.f32.mrb[3].mxu1  ;;  %v2023_v27 = vmax.f32 %v2007_v44, 0.0  ;;  %v2513_v44 = vld [vmem:[%s4848_s8] ss:$0 sm:$0xff] }
 0x2ab   : > { %v2006_v10 = vadd.f32 %v2503_v34, %v1922_v51  ;;  %v2021_v43 = vmax.f32 %v2005_v30, 0.0  ;;  %v4723_v56 = vadd.f32 %v2513_v44, %v2504_v2 }
 0x2ac   : > { %v2024_v49 = vmax.f32 %v2008_v5, 0.0 }
 0x2ad   : > { %v2022_v63 = vmax.f32 %v2006_v10, 0.0 }
 0x2ae   : > { %v2038_v7 = vpack.c.bf16 %v2024_v49, %v2023_v27 }
 0x2af   : > { %v2037_v38 = vpack.c.bf16 %v2022_v63, %v2021_v43  ;;  %v2664_v47 = vpop.f32.mrb[4].mxu1 }
 0x2b0   : > { %v2011_v53 = vadd.f32 %v2664_v47, %v2503_v34  ;;  %v1935_v45 = vpop.f32.mrb[5].mxu1 }
 0x2b1   : > { %v2009_v16 = vadd.f32 %v2503_v34, %v1935_v45  ;;  %v2665_v55 = vpop.f32.mrb[6].mxu1  ;;  %2676 = vmatprep.mubr.msk.bf16.mxu0 %vm1221_vm14, %v2037_v38 }
 0x2b2   : > { %v2012_v29 = vadd.f32 %v2665_v55, %v2503_v34  ;;  %v1938_v6 = vpop.f32.mrb[7].mxu1  ;;  %2677 = vmatmul.mubr.msk.bf16.vlgmr.msra.gmra.mrb[20].mxu0 %vm1221_vm14, %v2038_v7  ;;  %v2027_v15 = vmax.f32 %v2011_v53, 0.0 }
 0x2b3   : > { %v2010_v52 = vadd.f32 %v2503_v34, %v1938_v6  ;;  %2693 = vmatpush3.bf16.msra.mxu0 %v3056_v41  ;;  %v2025_v19 = vmax.f32 %v2009_v16, 0.0  ;;  %v3063_v41 = vld [vmem:[%s3295_s25 + $0x38] sm:$0xff]  }
 0x2b4   : > { %v2028_v17 = vmax.f32 %v2012_v29, 0.0 }
 0x2b5   : > { %v2026_v12 = vmax.f32 %v2010_v52, 0.0 }
 0x2b6   : > { %v2040_v24 = vpack.c.bf16 %v2028_v17, %v2027_v15 }
 0x2b7   : > { %v2039_v23 = vpack.c.bf16 %v2026_v12, %v2025_v19  ;;  %v2668_v36 = vpop.f32.mrb[8].mxu1 }
 0x2b8   : > { %v2015_v50 = vadd.f32 %v2668_v36, %v2503_v34  ;;  %v1951_v37 = vpop.f32.mrb[9].mxu1 }
 0x2b9   : > { %v2013_v62 = vadd.f32 %v2503_v34, %v1951_v37  ;;  %v2669_v58 = vpop.f32.mrb[10].mxu1  ;;  %2680 = vmatprep.mubr.msk.bf16.mxu0 %vm1221_vm14, %v2039_v23 }
 0x2ba   : > { %v2016_v8 = vadd.f32 %v2669_v58, %v2503_v34  ;;  %v1954_v18 = vpop.f32.mrb[11].mxu1  ;;  %2681 = vmatmul.mubr.msk.bf16.gmra.mrb[24].mxu0 %vm1221_vm14, %v2040_v24  ;;  %v2031_v22 = vmax.f32 %v2015_v50, 0.0 }
 0x2bb   : > { %v2014_v14 = vadd.f32 %v2503_v34, %v1954_v18  ;;  %v2029_v31 = vmax.f32 %v2013_v62, 0.0 }
 0x2bc   : > { %v2032_v11 = vmax.f32 %v2016_v8, 0.0 }
 0x2bd   : > { %v2030_v3 = vmax.f32 %v2014_v14, 0.0 }
 0x2be   : > { %v2042_v54 = vpack.c.bf16 %v2032_v11, %v2031_v22 }
 0x2bf   : > { %v2041_v32 = vpack.c.bf16 %v2030_v3, %v2029_v31  ;;  %v2672_v59 = vpop.f32.mrb[12].mxu1 }
 0x2c0   : > { %v2019_v26 = vadd.f32 %v2672_v59, %v2503_v34  ;;  %v1967_v21 = vpop.f32.mrb[13].mxu1 }
 0x2c1   : > { %v2017_v1 = vadd.f32 %v2503_v34, %v1967_v21  ;;  %v2673_v13 = vpop.f32.mrb[14].mxu1  ;;  %2684 = vmatprep.mubr.msk.bf16.mxu0 %vm1221_vm14, %v2041_v32 }
 0x2c2   : > { %v2020_v57 = vadd.f32 %v2673_v13, %v2503_v34  ;;  %v1970_v42 = vpop.f32.mrb[15].mxu1  ;;  %2685 = vmatmul.mubr.msk.bf16.gmra.mrb[28].mxu0 %vm1221_vm14, %v2042_v54  ;;  %v2035_v39 = vmax.f32 %v2019_v26, 0.0 }
 0x2c3   : > { %v2018_v0 = vadd.f32 %v2503_v34, %v1970_v42  ;;  %v2033_v33 = vmax.f32 %v2017_v1, 0.0  ;;  %v3064_v34 = vld [vmem:[%s3295_s25 + $0x40] sm:$0xff]   ;;  %s4729_s25 = scalar_lea.vmem [#allocation2], %s2438_s21  ;;  %s4787_s21 = scalar_lea.sflag [#allocation3], %s337_s18 }
 0x2c4   : > { %v2036_v4 = vmax.f32 %v2020_v57, 0.0  ;;  %s2355_s12 = sshll.u32 %s4729_s25, 4  ;;  %s4772_s12 = int_to_ptr.vmem [resolvable:$true] %s2355_s12 }
 0x2c5   : > { %v2034_v9 = vmax.f32 %v2018_v0, 0.0  ;;  %s3065_s24 = scalar_lea.vmem %s4772_s12, 2048  ;;  %p3072_p2 = scmp.lt.s32.totalorder %s4772_s12, %s3070_s26 }
 0x2c6   : > { %v2044_v35 = vpack.c.bf16 %v2036_v4, %v2035_v39  ;;  %p3066_p13 = scmp.ne.s32.totalorder %s4772_s12, %s3065_s24  ;;  %p3073_p4 = scmp.lt.s32.totalorder %s3071_s19, %s3065_s24 }
 0x2c7   : > { %v2043_v40 = vpack.c.bf16 %v2034_v9, %v2033_v33 }
 0x2c8   : > { %p3067_p0 = pnand %p3066_p13, %p3266_p3  ;;  %p3074_p5 = por %p3073_p4, %p3072_p2 }
 0x2c9   : > { %2688 = vmatprep.mubr.msk.bf16.mxu0 %vm1221_vm14, %v2043_v40 }
 0x2ca   : > { %2689 = vmatmul.mubr.msk.bf16.gmra.mrb[32].mxu0 %vm1221_vm14, %v2044_v35  ;;  %vm5123_vm14 = vmmov %vm5069_vm0  ;;  %p3068_p1 = pneg %p3067_p0 }
 0x2cb   : > { %2694 = vmatprep.mubr.msk.bf16.mxu0 %vm5118_vm5, %v3057_v61 }
 0x2cc   : > { %p3075_p6 = pnand %p3074_p5, %p3068_p1 }
 0x2d2   : > { %2695 = vmatmul.mubr.msk.bf16.vlgmr.msra.gmra.mrb[20].mxu0 %vm5119_vm4, %v3058_v28 }
 0x2d3   : > { %2698 = vmatprep.mubr.msk.bf16.mxu0 %vm5069_vm0, %v3059_v25 }
 0x2da   : > { %2699 = vmatmul.mubr.msk.bf16.gmra.mrb[24].mxu0 %vm5120_vm8, %v3060_v60 }
 0x2db   : > { %2702 = vmatprep.mubr.msk.bf16.mxu0 %vm5121_vm10, %v3061_v46 }
 0x2e2   : > { %2703 = vmatmul.mubr.msk.bf16.gmra.mrb[28].mxu0 %vm5122_vm12, %v3062_v20 }
 0x2e3   : > { %2706 = vmatprep.mubr.msk.bf16.mxu0 %vm5123_vm14, %v3063_v41 }
 0x2ea   : > { %2707 = vmatmul.mubr.msk.bf16.gmra.mrb[32].mxu0 %vm5124_vm2, %v3064_v34 }
 0x3a5   : > { %v2696_v30 = vpop.f32.mrb[20].mxu0 }
 0x3a6   : > { %v2710_v48 = vadd.f32 %v2696_v30, %v2504_v2  ;;  %v2226_v5 = vpop.f32.mrb[21].mxu0 }
 0x3a7   : > { %v2712_v51 = vadd.f32 %v2504_v2, %v2226_v5  ;;  %v2697_v10 = vpop.f32.mrb[22].mxu0 }
 0x3a8   : > { %v2711_v27 = vadd.f32 %v2710_v48, %v2513_v44  ;;  %v2715_v49 = vadd.f32 %v4723_v56, %v2697_v10  ;;  %v2229_v43 = vpop.f32.mrb[23].mxu0 }
 0x3a9   : > { %v2713_v63 = vadd.f32 %v2712_v51, %v2513_v44  ;;  %v2717_v7 = vadd.f32 %v4723_v56, %v2229_v43 }
 0x3aa   : > { %v2307_v38 = vmax.f32 %v2711_v27, 0.0  ;;  %v2308_v47 = vmax.f32 %v2715_v49, 0.0 }
 0x3ab   : > { %v2305_v53 = vmax.f32 %v2713_v63, 0.0  ;;  %v2306_v45 = vmax.f32 %v2717_v7, 0.0 }
 0x3ac   : > { %2324 = vst.msk [vmem:[%s4729_s25 + $0x10] sm:$0xff] %vm2321_vm3, %v2307_v38  ;;  %2325 = vst.msk [vmem:[%s4729_s25 + $0x18] sm:$0xff] %vm2321_vm3, %v2308_v47 }
 0x3ad   : > { %2322 = vst.msk [vmem:[%s4729_s25] sm:$0xff] %vm2321_vm3, %v2305_v53  ;;  %2323 = vst.msk [vmem:[%s4729_s25 + $0x8] sm:$0xff] %vm2321_vm3, %v2306_v45  ;;  %v2700_v16 = vpop.f32.mrb[24].mxu0 }
 0x3ae   : > { %v2719_v55 = vadd.f32 %v4723_v56, %v2700_v16  ;;  %v2242_v29 = vpop.f32.mrb[25].mxu0 }
 0x3af   : > { %v2721_v6 = vadd.f32 %v4723_v56, %v2242_v29  ;;  %v2701_v52 = vpop.f32.mrb[26].mxu0 }
 0x3b0   : > { %v2311_v15 = vmax.f32 %v2719_v55, 0.0  ;;  %v2723_v17 = vadd.f32 %v4723_v56, %v2701_v52  ;;  %v2245_v19 = vpop.f32.mrb[27].mxu0 }
 0x3b1   : > { %v2309_v12 = vmax.f32 %v2721_v6, 0.0  ;;  %v2725_v24 = vadd.f32 %v4723_v56, %v2245_v19 }
 0x3b2   : > { %2328 = vst.msk [vmem:[%s4729_s25 + $0x30] sm:$0xff] %vm2321_vm3, %v2311_v15  ;;  %v2312_v23 = vmax.f32 %v2723_v17, 0.0 }
 0x3b3   : > { %2326 = vst.msk [vmem:[%s4729_s25 + $0x20] sm:$0xff] %vm2321_vm3, %v2309_v12  ;;  %v2310_v36 = vmax.f32 %v2725_v24, 0.0 }
 0x3b4   : > { %2329 = vst.msk [vmem:[%s4729_s25 + $0x38] sm:$0xff] %vm2321_vm3, %v2312_v23 }
 0x3b5   : > { %2327 = vst.msk [vmem:[%s4729_s25 + $0x28] sm:$0xff] %vm2321_vm3, %v2310_v36  ;;  %v2704_v50 = vpop.f32.mrb[28].mxu0 }
 0x3b6   : > { %v2727_v37 = vadd.f32 %v4723_v56, %v2704_v50  ;;  %v2258_v62 = vpop.f32.mrb[29].mxu0 }
 0x3b7   : > { %v2729_v58 = vadd.f32 %v4723_v56, %v2258_v62  ;;  %v2705_v8 = vpop.f32.mrb[30].mxu0 }
 0x3b8   : > { %v2315_v18 = vmax.f32 %v2727_v37, 0.0  ;;  %v2731_v14 = vadd.f32 %v4723_v56, %v2705_v8  ;;  %v2261_v22 = vpop.f32.mrb[31].mxu0 }
 0x3b9   : > { %v2313_v11 = vmax.f32 %v2729_v58, 0.0  ;;  %v2733_v31 = vadd.f32 %v4723_v56, %v2261_v22 }
 0x3ba   : > { %2332 = vst.msk [vmem:[%s4729_s25 + $0x50] sm:$0xff] %vm2321_vm3, %v2315_v18  ;;  %v2316_v3 = vmax.f32 %v2731_v14, 0.0 }
 0x3bb   : > { %2330 = vst.msk [vmem:[%s4729_s25 + $0x40] sm:$0xff] %vm2321_vm3, %v2313_v11  ;;  %v2314_v54 = vmax.f32 %v2733_v31, 0.0 }
 0x3bc   : > { %2333 = vst.msk [vmem:[%s4729_s25 + $0x58] sm:$0xff] %vm2321_vm3, %v2316_v3 }
 0x3bd   : > { %2331 = vst.msk [vmem:[%s4729_s25 + $0x48] sm:$0xff] %vm2321_vm3, %v2314_v54  ;;  %v2708_v32 = vpop.f32.mrb[32].mxu0 }
 0x3be   : > { %v2735_v59 = vadd.f32 %v4723_v56, %v2708_v32  ;;  %v2274_v26 = vpop.f32.mrb[33].mxu0 }
 0x3bf   : > { %v2737_v21 = vadd.f32 %v4723_v56, %v2274_v26  ;;  %v2709_v1 = vpop.f32.mrb[34].mxu0 }
 0x3c0   : > { %v2319_v13 = vmax.f32 %v2735_v59, 0.0  ;;  %v2739_v57 = vadd.f32 %v4723_v56, %v2709_v1  ;;  %v2277_v42 = vpop.f32.mrb[35].mxu0 }
 0x3c1   : > { %v2317_v0 = vmax.f32 %v2737_v21, 0.0  ;;  %v2741_v39 = vadd.f32 %v4723_v56, %v2277_v42 }
 0x3c2   : > { %2336 = vst.msk [vmem:[%s4729_s25 + $0x70] sm:$0xff] %vm2321_vm3, %v2319_v13  ;;  %v2320_v4 = vmax.f32 %v2739_v57, 0.0 }
 0x3c3   : > { %2334 = vst.msk [vmem:[%s4729_s25 + $0x60] sm:$0xff] %vm2321_vm3, %v2317_v0  ;;  %v2318_v33 = vmax.f32 %v2741_v39, 0.0 }
 0x3c4   : > { %2337 = vst.msk [vmem:[%s4729_s25 + $0x78] sm:$0xff] %vm2321_vm3, %v2320_v4 }
 0x3c5   : > { %2335 = vst.msk [vmem:[%s4729_s25 + $0x68] sm:$0xff] %vm2321_vm3, %v2318_v33 }
 0x3c6   : > { %3078 = shalt.err (!%p3075_p6)
}
 0x3c7   : > { %s3079_s18 = scalar_lea.hbm %s4779_s17, 2048  ;;  %s3083_s28 = scalar_lea.hbm %s4849_s9, 8192 }
 0x3c8   : > { %p3080_p7 = scmp.ne.s32.totalorder %s4779_s17, %s3079_s18  ;;  %p3084_p11 = scmp.lt.u32.totalorder %s4779_s17, %s4849_s9 }
 0x3c9   : > { %p3085_p12 = scmp.lt.u32.totalorder %s3083_s28, %s3079_s18  ;;  %p3087_p0 = scmp.lt.u32.totalorder %s3079_s18, %s4779_s17 }
 0x3ca   : > { %p3081_p9 = pnand %p3080_p7, %p3266_p3 }
 0x3cb   : > { %p3086_p13 = por %p3085_p12, %p3084_p11 }
 0x3cc   : > { %p3082_p10 = pneg %p3081_p9 }
 0x3cd   : > { %p3088_p1 = por %p3087_p0, %p3086_p13 }
 0x3cf   : > { %p3089_p2 = pnand %p3088_p1, %p3082_p10 }
 0x3d1   : > { %3092 = shalt.err (!%p3089_p2)
}
 0x3d2   : > { %s3164_s19 = smov 128   ;;  %s5125_s24 = smov 8  }
 0x3d3   : > { %2795 = dma.vmem_to_hbm [thread:$0]  (%p3266_p3), %s4772_s12, 2048, %s4779_s17, %s4787_s21, %s3164_s19, %s3164_s19, %s5125_s24  }
 0x3d4 PF: > { %p2801_p4 = scmp.ge.s32.totalorder %s3159_s16, 2  ;;  %s2370_s26 = sand.u32 1, %s3131_s30  }
 0x3d5   : > { %s2371_s18 = scalar_lea.sflag [#allocation3], %s2370_s26 }
 0x3d6   : > { %p2798_p5 = pnand %p2801_p4, %p3275_p8 }
 0x3d8   : > { %3126 = dma.done.wait (!%p2798_p5), %s2371_s18, 2048  }
 0x3d9   : > { %3128 = vsyncadd (!%p2798_p5), %s2371_s18, 4294965248  ;;  %s22_s16 = sadd.s32 1, %s3159_s16   ;;  %s5126_s22 = sld [smem:[#allocation5_spill]] }
 0x3da   : > { %p19_p6 = scmp.ge.s32.totalorder %s22_s16, 6   ;;  %s5127_s17 = sld [smem:[#allocation6_spill]] }
 0x3db   : > { %s5128_s30 = smov %s3135_s10  ;;  %s5129_s10 = smov %s3139_s11 }
 0x3dc   : > { %s5130_s11 = smov %s3284_s27  ;;  %s5131_s12 = smov %s3151_s14 }
 0x3dd   : > { %s5132_s13 = smov %s3155_s15  ;;  %21 = sbr.rel (!%p19_p6) target bundleno = 5 (0x5), region = 94 }
 0x3df   : > { %s5133_s14 = smov %s5126_s22 }
 0x3e0   : > { %s5134_s15 = smov %s5127_s17 }
 0x3e4   :  { %2376 = vsyncpa [#allocation3], 1 }
 0x3e5   :  { %2378 = vsyncpa [#allocation3 + $0x1], 1 }

</bundles_post_ra>
